<compile_context>
chip_gen: v5e
topology: v5e:2x2
jax: 0.10.0
libtpu: 0.0.40
codegen_flags: <defaults>
</compile_context>

<pallas_src>
import functools

import jax
import jax.numpy as jnp
from jax import lax
from jax.experimental import pallas as pl
from jax.experimental.pallas import tpu as pltpu

LN_EPS = 1e-5
F_REAL = 17     # true feature dim (== n_heads in the PyTorch module)
FP = 128        # feature dim zero-padded to one full lane group
HID = 256       # transformer feed-forward hidden dim
HH = 32         # per-head (mean / log_std) MLP hidden dim
OP = 128        # packed output width: col 0 value, 1:1+A mean, 1+A:1+2A std
NB_ROWS = 24    # bias/LN rows in the slab (18 used, padded to sublane multiple)
BROW0 = 5 * FP + HID         # 896: first bias row inside the packed slab
PROWS = BROW0 + NB_ROWS      # 920 total slab rows (multiple of 8)
PCOLS = 2 * FP               # 256 slab columns (multiple of 128)

# Bias row indices (relative to BROW0).
(ROW_C_BATTN, ROW_C_B1, ROW_C_B2, ROW_C_G1, ROW_C_BE1, ROW_C_G2, ROW_C_BE2,
 ROW_VH_B,
 ROW_A_BATTN, ROW_A_B1, ROW_A_B2, ROW_A_G1, ROW_A_BE1, ROW_A_G2, ROW_A_BE2,
 ROW_HB1, ROW_HB2, ROW_HB3) = range(18)


def _layernorm(h, g, b, feat_mask):
    """LayerNorm over the 17 real features; padded lanes stay exactly zero."""
    inv_n = 1.0 / F_REAL
    mu = jnp.sum(h, axis=-1, keepdims=True) * inv_n
    d = (h - mu) * feat_mask
    var = jnp.sum(d * d, axis=-1, keepdims=True) * inv_n
    return d * lax.rsqrt(var + LN_EPS) * g + b


def _block(x, w_attn, b_attn, w1, b1, w2, b2, g1, be1, g2, be2, feat_mask):
    # seq_len == 1 => attention == out_proj(value_proj(x)), pre-folded into
    # (w_attn, b_attn) at pack time.  Dropout == identity (eval mode).
    attn = jnp.dot(x, w_attn, preferred_element_type=jnp.float32) + b_attn
    h = _layernorm(x + attn, g1, be1, feat_mask)
    ff = jnp.maximum(jnp.dot(h, w1, preferred_element_type=jnp.float32) + b1, 0.0)
    ff = jnp.dot(ff, w2, preferred_element_type=jnp.float32) + b2
    return _layernorm(h + ff, g2, be2, feat_mask)


def a2c_kernel(x_ref, p_ref, out_ref, *, n_actions):
    x = x_ref[...]                                        # [E, FP], padded lanes zero
    lane = lax.broadcasted_iota(jnp.int32, (1, FP), 1)
    feat_mask = (lane < F_REAL).astype(jnp.float32)

    # --- static, (8,128)-aligned views into the single packed weight slab ---
    c_wattn = p_ref[0 * FP:1 * FP, 0:FP]
    a_wattn = p_ref[0 * FP:1 * FP, FP:2 * FP]
    c_w1    = p_ref[1 * FP:2 * FP, 0:HID]
    a_w1    = p_ref[2 * FP:3 * FP, 0:HID]
    vh_w    = p_ref[3 * FP:4 * FP, 0:FP]      # only col 0 is real
    hw1     = p_ref[3 * FP:4 * FP, FP:2 * FP]  # fused head layer 1
    c_w2    = p_ref[4 * FP:4 * FP + HID, 0:FP]
    a_w2    = p_ref[4 * FP:4 * FP + HID, FP:2 * FP]
    hw2     = p_ref[4 * FP + HID:5 * FP + HID, 0:FP]       # fused head layer 2
    hw3     = p_ref[4 * FP + HID:5 * FP + HID, FP:2 * FP]  # fused head layer 3

    def brow(r, width=FP):
        return p_ref[BROW0 + r:BROW0 + r + 1, 0:width]

    # ---- critic path ----
    hc = _block(x, c_wattn, brow(ROW_C_BATTN), c_w1, brow(ROW_C_B1, HID),
                c_w2, brow(ROW_C_B2), brow(ROW_C_G1), brow(ROW_C_BE1),
                brow(ROW_C_G2), brow(ROW_C_BE2), feat_mask)
    # value lands in output column 0; every other column of this term is zero.
    value_out = (jnp.dot(hc, vh_w, preferred_element_type=jnp.float32)
                 + brow(ROW_VH_B, OP))

    # ---- actor path (fused mean / log_std heads) ----
    ha = _block(x, a_wattn, brow(ROW_A_BATTN), a_w1, brow(ROW_A_B1, HID),
                a_w2, brow(ROW_A_B2), brow(ROW_A_G1), brow(ROW_A_BE1),
                brow(ROW_A_G2), brow(ROW_A_BE2), feat_mask)
    h1 = jnp.maximum(jnp.dot(ha, hw1, preferred_element_type=jnp.float32)
                     + brow(ROW_HB1), 0.0)     # cols 0:32 mean branch, 32:64 log_std
    h2 = jnp.maximum(jnp.dot(h1, hw2, preferred_element_type=jnp.float32)
                     + brow(ROW_HB2), 0.0)
    head = (jnp.dot(h2, hw3, preferred_element_type=jnp.float32)
            + brow(ROW_HB3, OP))               # cols 1:1+A mean, 1+A:1+2A log_std

    out_lane = lax.broadcasted_iota(jnp.int32, head.shape, 1)
    is_std = (out_lane >= 1 + n_actions) & (out_lane < 1 + 2 * n_actions)
    std_vals = jnp.exp(jnp.clip(head, -20.0, 2.0))
    out_ref[...] = value_out + jnp.where(is_std, std_vals, head)


def pack_params(p, n_actions):
    """Fold + fuse + zero-pad all raw [in,out]-layout params into ONE slab."""
    A = n_actions
    f32 = jnp.float32

    def fold_attn(prefix):
        w = p[prefix + "_wv"] @ p[prefix + "_wo"]
        b = p[prefix + "_bv"] @ p[prefix + "_wo"] + p[prefix + "_bo"]
        return w, b

    c_wattn, c_battn = fold_attn("c")
    a_wattn, a_battn = fold_attn("a")

    P = jnp.zeros((PROWS, PCOLS), f32)                    # [920, 256]

    # rows 0:128   -> [c_wattn | a_wattn]
    P = P.at[0:F_REAL, 0:F_REAL].set(c_wattn)
    P = P.at[0:F_REAL, FP:FP + F_REAL].set(a_wattn)
    # rows 128:256 -> c_w1 ; rows 256:384 -> a_w1
    P = P.at[FP:FP + F_REAL, 0:HID].set(p["c_w1"])
    P = P.at[2 * FP:2 * FP + F_REAL, 0:HID].set(p["a_w1"])
    # rows 384:512 -> [value head | fused mean/log_std layer-1]
    P = P.at[3 * FP:3 * FP + F_REAL, 0:1].set(p["vh_w"])
    P = P.at[3 * FP:3 * FP + F_REAL, FP:FP + HH].set(p["m_w1"])
    P = P.at[3 * FP:3 * FP + F_REAL, FP + HH:FP + 2 * HH].set(p["s_w1"])
    # rows 512:768 -> [c_w2 | a_w2]   (feed-forward second layers, [HID, F])
    P = P.at[4 * FP:4 * FP + HID, 0:F_REAL].set(p["c_w2"])
    P = P.at[4 * FP:4 * FP + HID, FP:FP + F_REAL].set(p["a_w2"])
    # rows 768:896 -> [fused head layer 2 | fused head layer 3] (block-diagonal)
    base = 4 * FP + HID
    P = P.at[base:base + HH, 0:HH].set(p["m_w2"])
    P = P.at[base + HH:base + 2 * HH, HH:2 * HH].set(p["s_w2"])
    P = P.at[base:base + HH, FP + 1:FP + 1 + A].set(p["m_w3"])
    P = P.at[base + HH:base + 2 * HH, FP + 1 + A:FP + 1 + 2 * A].set(p["s_w3"])

    # rows 896:920 -> biases / LayerNorm affines (one row each, zero padded)
    def setrow(arr, r, v, col=0):
        return arr.at[BROW0 + r:BROW0 + r + 1, col:col + v.shape[1]].set(v)

    P = setrow(P, ROW_C_BATTN, c_battn)
    P = setrow(P, ROW_C_B1, p["c_b1"])
    P = setrow(P, ROW_C_B2, p["c_b2"])
    P = setrow(P, ROW_C_G1, p["c_g1"])
    P = setrow(P, ROW_C_BE1, p["c_be1"])
    P = setrow(P, ROW_C_G2, p["c_g2"])
    P = setrow(P, ROW_C_BE2, p["c_be2"])
    P = setrow(P, ROW_VH_B, p["vh_b"])                    # scalar -> col 0
    P = setrow(P, ROW_A_BATTN, a_battn)
    P = setrow(P, ROW_A_B1, p["a_b1"])
    P = setrow(P, ROW_A_B2, p["a_b2"])
    P = setrow(P, ROW_A_G1, p["a_g1"])
    P = setrow(P, ROW_A_BE1, p["a_be1"])
    P = setrow(P, ROW_A_G2, p["a_g2"])
    P = setrow(P, ROW_A_BE2, p["a_be2"])
    P = setrow(P, ROW_HB1, p["m_b1"])
    P = setrow(P, ROW_HB1, p["s_b1"], col=HH)
    P = setrow(P, ROW_HB2, p["m_b2"])
    P = setrow(P, ROW_HB2, p["s_b2"], col=HH)
    P = setrow(P, ROW_HB3, p["m_b3"], col=1)
    P = setrow(P, ROW_HB3, p["s_b3"], col=1 + A)
    return {"slab": P}


def a2c_forward(x, packed, n_actions):
    """x: [E, 17] f32 -> (value [E,1], mean [E,A], std [E,A])."""
    E = x.shape[0]
    A = n_actions
    assert 1 + 2 * A <= OP
    x_pad = jnp.zeros((E, FP), jnp.float32).at[:, :x.shape[1]].set(x)
    slab = packed["slab"]

    vmem = pl.BlockSpec(memory_space=pltpu.MemorySpace.VMEM)
    macs_per_row = 2 * (FP * FP + 2 * FP * HID) + 4 * FP * FP
    cost = pl.CostEstimate(
        flops=int(2 * E * macs_per_row),
        transcendentals=int(E * (OP + 4)),
        bytes_accessed=int(4 * (x_pad.size + slab.size + E * OP)),
    )
    out = pl.pallas_call(
        functools.partial(a2c_kernel, n_actions=A),
        out_shape=jax.ShapeDtypeStruct((E, OP), jnp.float32),
        in_specs=[vmem, vmem],
        out_specs=vmem,
        cost_estimate=cost,
    )(x_pad, slab)

    value = out[:, 0:1]
    mean = out[:, 1:1 + A]
    std = out[:, 1 + A:1 + 2 * A]
    return value, mean, std


def _dense(key, fan_in, fan_out):
    """PyTorch nn.Linear-style uniform init; weight returned as [in, out]."""
    kw, kb = jax.random.split(key)
    bound = 1.0 / float(fan_in) ** 0.5
    w = jax.random.uniform(kw, (fan_in, fan_out), jnp.float32, -bound, bound)
    b = jax.random.uniform(kb, (1, fan_out), jnp.float32, -bound, bound)
    return w, b


def init_params(key, n_features, n_actions, hidden_dim):
    keys = jax.random.split(key, 32)
    ki = iter(keys)
    p = {}

    def transformer(prefix):
        p[prefix + "_wv"], p[prefix + "_bv"] = _dense(next(ki), n_features, n_features)
        p[prefix + "_wo"], p[prefix + "_bo"] = _dense(next(ki), n_features, n_features)
        p[prefix + "_w1"], p[prefix + "_b1"] = _dense(next(ki), n_features, hidden_dim)
        p[prefix + "_w2"], p[prefix + "_b2"] = _dense(next(ki), hidden_dim, n_features)
        p[prefix + "_g1"] = jnp.ones((1, n_features), jnp.float32)
        p[prefix + "_be1"] = jnp.zeros((1, n_features), jnp.float32)
        p[prefix + "_g2"] = jnp.ones((1, n_features), jnp.float32)
        p[prefix + "_be2"] = jnp.zeros((1, n_features), jnp.float32)

    transformer("c")
    transformer("a")
    p["vh_w"], p["vh_b"] = _dense(next(ki), n_features, 1)
    for h in ("m", "s"):
        # head input dim == num_heads == n_features (=17) per the PyTorch module
        p[h + "_w1"], p[h + "_b1"] = _dense(next(ki), n_features, HH)
        p[h + "_w2"], p[h + "_b2"] = _dense(next(ki), HH, HH)
        p[h + "_w3"], p[h + "_b3"] = _dense(next(ki), HH, n_actions)
    return p


def a2c_reference(x, p):
    """Pure-JAX reference of the PyTorch forward (unfolded / unfused)."""
    hp = lax.Precision.HIGHEST

    def ln(h, g, b):
        mu = jnp.mean(h, -1, keepdims=True)
        var = jnp.mean((h - mu) ** 2, -1, keepdims=True)
        return (h - mu) * lax.rsqrt(var + LN_EPS) * g + b

    def block(xx, pre):
        v = jnp.dot(xx, p[pre + "_wv"], precision=hp) + p[pre + "_bv"]
        attn = jnp.dot(v, p[pre + "_wo"], precision=hp) + p[pre + "_bo"]
        h = ln(xx + attn, p[pre + "_g1"], p[pre + "_be1"])
        ff = jax.nn.relu(jnp.dot(h, p[pre + "_w1"], precision=hp) + p[pre + "_b1"])
        ff = jnp.dot(ff, p[pre + "_w2"], precision=hp) + p[pre + "_b2"]
        return ln(h + ff, p[pre + "_g2"], p[pre + "_be2"])

    def mlp3(h, pre):
        h = jax.nn.relu(jnp.dot(h, p[pre + "_w1"], precision=hp) + p[pre + "_b1"])
        h = jax.nn.relu(jnp.dot(h, p[pre + "_w2"], precision=hp) + p[pre + "_b2"])
        return jnp.dot(h, p[pre + "_w3"], precision=hp) + p[pre + "_b3"]

    hc = block(x, "c")
    value = jnp.dot(hc, p["vh_w"], precision=hp) + p["vh_b"]
    ha = block(x, "a")
    mean = mlp3(ha, "m")
    log_std = jnp.clip(mlp3(ha, "s"), -20.0, 2.0)
    return value, mean, jnp.exp(log_std)


if __name__ == "__main__":
    n_envs_local = 16     # matches the module's n_envs (two sublane groups)
    n_features = 17       # forced: mean/log_std heads take num_heads=17 inputs
    n_actions = 4
    hidden_dim = 256      # TransformerBlock feed-forward hidden dim (A2C.__init__)

    key = jax.random.PRNGKey(0)
    kx, kp = jax.random.split(key)
    x = jax.random.normal(kx, (n_envs_local, n_features), jnp.float32)
    params = init_params(kp, n_features, n_actions, hidden_dim)
    packed = pack_params(params, n_actions)   # one-time fold / fuse / pack

    fwd = jax.jit(functools.partial(a2c_forward, n_actions=n_actions))
    value, mean, std = fwd(x, packed)
    jax.block_until_ready((value, mean, std))

    assert value.shape == (n_envs_local, 1)
    assert mean.shape == (n_envs_local, n_actions)
    assert std.shape == (n_envs_local, n_actions)
    assert bool(jnp.all(std > 0.0))

    # loose check vs the unfolded / unfused pure-JAX reference (f32 rounding
    # differs slightly after folding Wv@Wo and running the MXU matmuls)
    rv, rm, rs = a2c_reference(x, params)
    assert bool(jnp.allclose(value, rv, rtol=3e-2, atol=3e-2))
    assert bool(jnp.allclose(mean, rm, rtol=3e-2, atol=3e-2))
    assert bool(jnp.allclose(std, rs, rtol=3e-2, atol=3e-2))

    print("KERNEL_OK")
</pallas_src>

<mosaic_0001>
module attributes {stable_mosaic.version = 11 : i64} {
  func.func @a2c_kernel(%arg0: memref<16x128xf32, #tpu.memory_space<vmem>>, %arg1: memref<920x256xf32, #tpu.memory_space<vmem>>, %arg2: memref<16x128xf32, #tpu.memory_space<vmem>>) attributes {dimension_semantics = [], scalar_prefetch = 0 : i64, scratch_operands = 0 : i64, tpu.core_type = #tpu.core_type<tc>} {
    %c0 = arith.constant 0 : index
    %c0_0 = arith.constant 0 : index
    %0 = vector.load %arg0[%c0, %c0_0] : memref<16x128xf32, #tpu.memory_space<vmem>>, vector<16x128xf32>
    %1 = tpu.iota {dimensions = array<i32: 1>} : vector<1x128xi32>
    %c17_i32 = arith.constant 17 : i32
    %2 = vector.broadcast %c17_i32 : i32 to vector<1x128xi32>
    %3 = arith.cmpi slt, %1, %2 : vector<1x128xi32>
    %4 = arith.extui %3 : vector<1x128xi1> to vector<1x128xi32>
    %5 = arith.sitofp %4 : vector<1x128xi32> to vector<1x128xf32>
    %c0_1 = arith.constant 0 : index
    %c0_2 = arith.constant 0 : index
    %6 = vector.load %arg1[%c0_1, %c0_2] : memref<920x256xf32, #tpu.memory_space<vmem>>, vector<128x128xf32>
    %c0_3 = arith.constant 0 : index
    %c128 = arith.constant 128 : index
    %7 = vector.load %arg1[%c0_3, %c128] : memref<920x256xf32, #tpu.memory_space<vmem>>, vector<128x128xf32>
    %c128_4 = arith.constant 128 : index
    %c0_5 = arith.constant 0 : index
    %8 = vector.load %arg1[%c128_4, %c0_5] : memref<920x256xf32, #tpu.memory_space<vmem>>, vector<128x256xf32>
    %c256 = arith.constant 256 : index
    %c0_6 = arith.constant 0 : index
    %9 = vector.load %arg1[%c256, %c0_6] : memref<920x256xf32, #tpu.memory_space<vmem>>, vector<128x256xf32>
    %c384 = arith.constant 384 : index
    %c0_7 = arith.constant 0 : index
    %10 = vector.load %arg1[%c384, %c0_7] : memref<920x256xf32, #tpu.memory_space<vmem>>, vector<128x128xf32>
    %c384_8 = arith.constant 384 : index
    %c128_9 = arith.constant 128 : index
    %11 = vector.load %arg1[%c384_8, %c128_9] : memref<920x256xf32, #tpu.memory_space<vmem>>, vector<128x128xf32>
    %c512 = arith.constant 512 : index
    %c0_10 = arith.constant 0 : index
    %12 = vector.load %arg1[%c512, %c0_10] : memref<920x256xf32, #tpu.memory_space<vmem>>, vector<256x128xf32>
    %c512_11 = arith.constant 512 : index
    %c128_12 = arith.constant 128 : index
    %13 = vector.load %arg1[%c512_11, %c128_12] : memref<920x256xf32, #tpu.memory_space<vmem>>, vector<256x128xf32>
    %c768 = arith.constant 768 : index
    %c0_13 = arith.constant 0 : index
    %14 = vector.load %arg1[%c768, %c0_13] : memref<920x256xf32, #tpu.memory_space<vmem>>, vector<128x128xf32>
    %c768_14 = arith.constant 768 : index
    %c128_15 = arith.constant 128 : index
    %15 = vector.load %arg1[%c768_14, %c128_15] : memref<920x256xf32, #tpu.memory_space<vmem>>, vector<128x128xf32>
    %c896 = arith.constant 896 : index
    %c0_16 = arith.constant 0 : index
    %16 = vector.load %arg1[%c896, %c0_16] : memref<920x256xf32, #tpu.memory_space<vmem>>, vector<1x128xf32>
    %c897 = arith.constant 897 : index
    %c0_17 = arith.constant 0 : index
    %17 = vector.load %arg1[%c897, %c0_17] : memref<920x256xf32, #tpu.memory_space<vmem>>, vector<1x256xf32>
    %c898 = arith.constant 898 : index
    %c0_18 = arith.constant 0 : index
    %18 = vector.load %arg1[%c898, %c0_18] : memref<920x256xf32, #tpu.memory_space<vmem>>, vector<1x128xf32>
    %c899 = arith.constant 899 : index
    %c0_19 = arith.constant 0 : index
    %19 = vector.load %arg1[%c899, %c0_19] : memref<920x256xf32, #tpu.memory_space<vmem>>, vector<1x128xf32>
    %c900 = arith.constant 900 : index
    %c0_20 = arith.constant 0 : index
    %20 = vector.load %arg1[%c900, %c0_20] : memref<920x256xf32, #tpu.memory_space<vmem>>, vector<1x128xf32>
    %c901 = arith.constant 901 : index
    %c0_21 = arith.constant 0 : index
    %21 = vector.load %arg1[%c901, %c0_21] : memref<920x256xf32, #tpu.memory_space<vmem>>, vector<1x128xf32>
    %c902 = arith.constant 902 : index
    %c0_22 = arith.constant 0 : index
    %22 = vector.load %arg1[%c902, %c0_22] : memref<920x256xf32, #tpu.memory_space<vmem>>, vector<1x128xf32>
    %cst = arith.constant dense<0.000000e+00> : vector<16x128xf32>
    %23 = tpu.matmul %0, %6, %cst {dimension_numbers = #tpu.dot_dimension_numbers<[1], [0], [0], [1], [0, 0, 1, 1], [], []>} : vector<16x128xf32>, vector<128x128xf32>, vector<16x128xf32> -> vector<16x128xf32>
    %24 = vector.broadcast %16 : vector<1x128xf32> to vector<16x128xf32>
    %25 = arith.addf %23, %24 : vector<16x128xf32>
    %26 = arith.addf %0, %25 : vector<16x128xf32>
    %cst_23 = arith.constant dense<0.000000e+00> : vector<16xf32>
    %27 = vector.multi_reduction <add>, %26, %cst_23 [1] : vector<16x128xf32> to vector<16xf32>
    %28 = vector.shape_cast %27 : vector<16xf32> to vector<16x1xf32>
    %cst_24 = arith.constant 0.0588235296 : f32
    %29 = vector.broadcast %cst_24 : f32 to vector<16x1xf32>
    %30 = arith.mulf %28, %29 : vector<16x1xf32>
    %31 = vector.broadcast %30 : vector<16x1xf32> to vector<16x128xf32>
    %32 = arith.subf %26, %31 : vector<16x128xf32>
    %33 = vector.broadcast %5 : vector<1x128xf32> to vector<16x128xf32>
    %34 = arith.mulf %32, %33 : vector<16x128xf32>
    %35 = arith.mulf %34, %34 : vector<16x128xf32>
    %cst_25 = arith.constant dense<0.000000e+00> : vector<16xf32>
    %36 = vector.multi_reduction <add>, %35, %cst_25 [1] : vector<16x128xf32> to vector<16xf32>
    %37 = vector.shape_cast %36 : vector<16xf32> to vector<16x1xf32>
    %cst_26 = arith.constant 0.0588235296 : f32
    %38 = vector.broadcast %cst_26 : f32 to vector<16x1xf32>
    %39 = arith.mulf %37, %38 : vector<16x1xf32>
    %cst_27 = arith.constant 9.99999974E-6 : f32
    %40 = vector.broadcast %cst_27 : f32 to vector<16x1xf32>
    %41 = arith.addf %39, %40 : vector<16x1xf32>
    %42 = math.rsqrt %41 : vector<16x1xf32>
    %43 = vector.broadcast %42 : vector<16x1xf32> to vector<16x128xf32>
    %44 = arith.mulf %34, %43 : vector<16x128xf32>
    %45 = vector.broadcast %19 : vector<1x128xf32> to vector<16x128xf32>
    %46 = arith.mulf %44, %45 : vector<16x128xf32>
    %47 = vector.broadcast %20 : vector<1x128xf32> to vector<16x128xf32>
    %48 = arith.addf %46, %47 : vector<16x128xf32>
    %cst_28 = arith.constant dense<0.000000e+00> : vector<16x256xf32>
    %49 = tpu.matmul %48, %8, %cst_28 {dimension_numbers = #tpu.dot_dimension_numbers<[1], [0], [0], [1], [0, 0, 1, 1], [], []>} : vector<16x128xf32>, vector<128x256xf32>, vector<16x256xf32> -> vector<16x256xf32>
    %50 = vector.broadcast %17 : vector<1x256xf32> to vector<16x256xf32>
    %51 = arith.addf %49, %50 : vector<16x256xf32>
    %cst_29 = arith.constant 0.000000e+00 : f32
    %52 = vector.broadcast %cst_29 : f32 to vector<16x256xf32>
    %53 = arith.maximumf %51, %52 : vector<16x256xf32>
    %cst_30 = arith.constant dense<0.000000e+00> : vector<16x128xf32>
    %54 = tpu.matmul %53, %12, %cst_30 {dimension_numbers = #tpu.dot_dimension_numbers<[1], [0], [0], [1], [0, 0, 1, 1], [], []>} : vector<16x256xf32>, vector<256x128xf32>, vector<16x128xf32> -> vector<16x128xf32>
    %55 = vector.broadcast %18 : vector<1x128xf32> to vector<16x128xf32>
    %56 = arith.addf %54, %55 : vector<16x128xf32>
    %57 = arith.addf %48, %56 : vector<16x128xf32>
    %cst_31 = arith.constant dense<0.000000e+00> : vector<16xf32>
    %58 = vector.multi_reduction <add>, %57, %cst_31 [1] : vector<16x128xf32> to vector<16xf32>
    %59 = vector.shape_cast %58 : vector<16xf32> to vector<16x1xf32>
    %cst_32 = arith.constant 0.0588235296 : f32
    %60 = vector.broadcast %cst_32 : f32 to vector<16x1xf32>
    %61 = arith.mulf %59, %60 : vector<16x1xf32>
    %62 = vector.broadcast %61 : vector<16x1xf32> to vector<16x128xf32>
    %63 = arith.subf %57, %62 : vector<16x128xf32>
    %64 = vector.broadcast %5 : vector<1x128xf32> to vector<16x128xf32>
    %65 = arith.mulf %63, %64 : vector<16x128xf32>
    %66 = arith.mulf %65, %65 : vector<16x128xf32>
    %cst_33 = arith.constant dense<0.000000e+00> : vector<16xf32>
    %67 = vector.multi_reduction <add>, %66, %cst_33 [1] : vector<16x128xf32> to vector<16xf32>
    %68 = vector.shape_cast %67 : vector<16xf32> to vector<16x1xf32>
    %cst_34 = arith.constant 0.0588235296 : f32
    %69 = vector.broadcast %cst_34 : f32 to vector<16x1xf32>
    %70 = arith.mulf %68, %69 : vector<16x1xf32>
    %cst_35 = arith.constant 9.99999974E-6 : f32
    %71 = vector.broadcast %cst_35 : f32 to vector<16x1xf32>
    %72 = arith.addf %70, %71 : vector<16x1xf32>
    %73 = math.rsqrt %72 : vector<16x1xf32>
    %74 = vector.broadcast %73 : vector<16x1xf32> to vector<16x128xf32>
    %75 = arith.mulf %65, %74 : vector<16x128xf32>
    %76 = vector.broadcast %21 : vector<1x128xf32> to vector<16x128xf32>
    %77 = arith.mulf %75, %76 : vector<16x128xf32>
    %78 = vector.broadcast %22 : vector<1x128xf32> to vector<16x128xf32>
    %79 = arith.addf %77, %78 : vector<16x128xf32>
    %cst_36 = arith.constant dense<0.000000e+00> : vector<16x128xf32>
    %80 = tpu.matmul %79, %10, %cst_36 {dimension_numbers = #tpu.dot_dimension_numbers<[1], [0], [0], [1], [0, 0, 1, 1], [], []>} : vector<16x128xf32>, vector<128x128xf32>, vector<16x128xf32> -> vector<16x128xf32>
    %c903 = arith.constant 903 : index
    %c0_37 = arith.constant 0 : index
    %81 = vector.load %arg1[%c903, %c0_37] : memref<920x256xf32, #tpu.memory_space<vmem>>, vector<1x128xf32>
    %82 = vector.broadcast %81 : vector<1x128xf32> to vector<16x128xf32>
    %83 = arith.addf %80, %82 : vector<16x128xf32>
    %c904 = arith.constant 904 : index
    %c0_38 = arith.constant 0 : index
    %84 = vector.load %arg1[%c904, %c0_38] : memref<920x256xf32, #tpu.memory_space<vmem>>, vector<1x128xf32>
    %c905 = arith.constant 905 : index
    %c0_39 = arith.constant 0 : index
    %85 = vector.load %arg1[%c905, %c0_39] : memref<920x256xf32, #tpu.memory_space<vmem>>, vector<1x256xf32>
    %c906 = arith.constant 906 : index
    %c0_40 = arith.constant 0 : index
    %86 = vector.load %arg1[%c906, %c0_40] : memref<920x256xf32, #tpu.memory_space<vmem>>, vector<1x128xf32>
    %c907 = arith.constant 907 : index
    %c0_41 = arith.constant 0 : index
    %87 = vector.load %arg1[%c907, %c0_41] : memref<920x256xf32, #tpu.memory_space<vmem>>, vector<1x128xf32>
    %c908 = arith.constant 908 : index
    %c0_42 = arith.constant 0 : index
    %88 = vector.load %arg1[%c908, %c0_42] : memref<920x256xf32, #tpu.memory_space<vmem>>, vector<1x128xf32>
    %c909 = arith.constant 909 : index
    %c0_43 = arith.constant 0 : index
    %89 = vector.load %arg1[%c909, %c0_43] : memref<920x256xf32, #tpu.memory_space<vmem>>, vector<1x128xf32>
    %c910 = arith.constant 910 : index
    %c0_44 = arith.constant 0 : index
    %90 = vector.load %arg1[%c910, %c0_44] : memref<920x256xf32, #tpu.memory_space<vmem>>, vector<1x128xf32>
    %cst_45 = arith.constant dense<0.000000e+00> : vector<16x128xf32>
    %91 = tpu.matmul %0, %7, %cst_45 {dimension_numbers = #tpu.dot_dimension_numbers<[1], [0], [0], [1], [0, 0, 1, 1], [], []>} : vector<16x128xf32>, vector<128x128xf32>, vector<16x128xf32> -> vector<16x128xf32>
    %92 = vector.broadcast %84 : vector<1x128xf32> to vector<16x128xf32>
    %93 = arith.addf %91, %92 : vector<16x128xf32>
    %94 = arith.addf %0, %93 : vector<16x128xf32>
    %cst_46 = arith.constant dense<0.000000e+00> : vector<16xf32>
    %95 = vector.multi_reduction <add>, %94, %cst_46 [1] : vector<16x128xf32> to vector<16xf32>
    %96 = vector.shape_cast %95 : vector<16xf32> to vector<16x1xf32>
    %cst_47 = arith.constant 0.0588235296 : f32
    %97 = vector.broadcast %cst_47 : f32 to vector<16x1xf32>
    %98 = arith.mulf %96, %97 : vector<16x1xf32>
    %99 = vector.broadcast %98 : vector<16x1xf32> to vector<16x128xf32>
    %100 = arith.subf %94, %99 : vector<16x128xf32>
    %101 = vector.broadcast %5 : vector<1x128xf32> to vector<16x128xf32>
    %102 = arith.mulf %100, %101 : vector<16x128xf32>
    %103 = arith.mulf %102, %102 : vector<16x128xf32>
    %cst_48 = arith.constant dense<0.000000e+00> : vector<16xf32>
    %104 = vector.multi_reduction <add>, %103, %cst_48 [1] : vector<16x128xf32> to vector<16xf32>
    %105 = vector.shape_cast %104 : vector<16xf32> to vector<16x1xf32>
    %cst_49 = arith.constant 0.0588235296 : f32
    %106 = vector.broadcast %cst_49 : f32 to vector<16x1xf32>
    %107 = arith.mulf %105, %106 : vector<16x1xf32>
    %cst_50 = arith.constant 9.99999974E-6 : f32
    %108 = vector.broadcast %cst_50 : f32 to vector<16x1xf32>
    %109 = arith.addf %107, %108 : vector<16x1xf32>
    %110 = math.rsqrt %109 : vector<16x1xf32>
    %111 = vector.broadcast %110 : vector<16x1xf32> to vector<16x128xf32>
    %112 = arith.mulf %102, %111 : vector<16x128xf32>
    %113 = vector.broadcast %87 : vector<1x128xf32> to vector<16x128xf32>
    %114 = arith.mulf %112, %113 : vector<16x128xf32>
    %115 = vector.broadcast %88 : vector<1x128xf32> to vector<16x128xf32>
    %116 = arith.addf %114, %115 : vector<16x128xf32>
    %cst_51 = arith.constant dense<0.000000e+00> : vector<16x256xf32>
    %117 = tpu.matmul %116, %9, %cst_51 {dimension_numbers = #tpu.dot_dimension_numbers<[1], [0], [0], [1], [0, 0, 1, 1], [], []>} : vector<16x128xf32>, vector<128x256xf32>, vector<16x256xf32> -> vector<16x256xf32>
    %118 = vector.broadcast %85 : vector<1x256xf32> to vector<16x256xf32>
    %119 = arith.addf %117, %118 : vector<16x256xf32>
    %cst_52 = arith.constant 0.000000e+00 : f32
    %120 = vector.broadcast %cst_52 : f32 to vector<16x256xf32>
    %121 = arith.maximumf %119, %120 : vector<16x256xf32>
    %cst_53 = arith.constant dense<0.000000e+00> : vector<16x128xf32>
    %122 = tpu.matmul %121, %13, %cst_53 {dimension_numbers = #tpu.dot_dimension_numbers<[1], [0], [0], [1], [0, 0, 1, 1], [], []>} : vector<16x256xf32>, vector<256x128xf32>, vector<16x128xf32> -> vector<16x128xf32>
    %123 = vector.broadcast %86 : vector<1x128xf32> to vector<16x128xf32>
    %124 = arith.addf %122, %123 : vector<16x128xf32>
    %125 = arith.addf %116, %124 : vector<16x128xf32>
    %cst_54 = arith.constant dense<0.000000e+00> : vector<16xf32>
    %126 = vector.multi_reduction <add>, %125, %cst_54 [1] : vector<16x128xf32> to vector<16xf32>
    %127 = vector.shape_cast %126 : vector<16xf32> to vector<16x1xf32>
    %cst_55 = arith.constant 0.0588235296 : f32
    %128 = vector.broadcast %cst_55 : f32 to vector<16x1xf32>
    %129 = arith.mulf %127, %128 : vector<16x1xf32>
    %130 = vector.broadcast %129 : vector<16x1xf32> to vector<16x128xf32>
    %131 = arith.subf %125, %130 : vector<16x128xf32>
    %132 = vector.broadcast %5 : vector<1x128xf32> to vector<16x128xf32>
    %133 = arith.mulf %131, %132 : vector<16x128xf32>
    %134 = arith.mulf %133, %133 : vector<16x128xf32>
    %cst_56 = arith.constant dense<0.000000e+00> : vector<16xf32>
    %135 = vector.multi_reduction <add>, %134, %cst_56 [1] : vector<16x128xf32> to vector<16xf32>
    %136 = vector.shape_cast %135 : vector<16xf32> to vector<16x1xf32>
    %cst_57 = arith.constant 0.0588235296 : f32
    %137 = vector.broadcast %cst_57 : f32 to vector<16x1xf32>
    %138 = arith.mulf %136, %137 : vector<16x1xf32>
    %cst_58 = arith.constant 9.99999974E-6 : f32
    %139 = vector.broadcast %cst_58 : f32 to vector<16x1xf32>
    %140 = arith.addf %138, %139 : vector<16x1xf32>
    %141 = math.rsqrt %140 : vector<16x1xf32>
    %142 = vector.broadcast %141 : vector<16x1xf32> to vector<16x128xf32>
    %143 = arith.mulf %133, %142 : vector<16x128xf32>
    %144 = vector.broadcast %89 : vector<1x128xf32> to vector<16x128xf32>
    %145 = arith.mulf %143, %144 : vector<16x128xf32>
    %146 = vector.broadcast %90 : vector<1x128xf32> to vector<16x128xf32>
    %147 = arith.addf %145, %146 : vector<16x128xf32>
    %cst_59 = arith.constant dense<0.000000e+00> : vector<16x128xf32>
    %148 = tpu.matmul %147, %11, %cst_59 {dimension_numbers = #tpu.dot_dimension_numbers<[1], [0], [0], [1], [0, 0, 1, 1], [], []>} : vector<16x128xf32>, vector<128x128xf32>, vector<16x128xf32> -> vector<16x128xf32>
    %c911 = arith.constant 911 : index
    %c0_60 = arith.constant 0 : index
    %149 = vector.load %arg1[%c911, %c0_60] : memref<920x256xf32, #tpu.memory_space<vmem>>, vector<1x128xf32>
    %150 = vector.broadcast %149 : vector<1x128xf32> to vector<16x128xf32>
    %151 = arith.addf %148, %150 : vector<16x128xf32>
    %cst_61 = arith.constant 0.000000e+00 : f32
    %152 = vector.broadcast %cst_61 : f32 to vector<16x128xf32>
    %153 = arith.maximumf %151, %152 : vector<16x128xf32>
    %cst_62 = arith.constant dense<0.000000e+00> : vector<16x128xf32>
    %154 = tpu.matmul %153, %14, %cst_62 {dimension_numbers = #tpu.dot_dimension_numbers<[1], [0], [0], [1], [0, 0, 1, 1], [], []>} : vector<16x128xf32>, vector<128x128xf32>, vector<16x128xf32> -> vector<16x128xf32>
    %c912 = arith.constant 912 : index
    %c0_63 = arith.constant 0 : index
    %155 = vector.load %arg1[%c912, %c0_63] : memref<920x256xf32, #tpu.memory_space<vmem>>, vector<1x128xf32>
    %156 = vector.broadcast %155 : vector<1x128xf32> to vector<16x128xf32>
    %157 = arith.addf %154, %156 : vector<16x128xf32>
    %cst_64 = arith.constant 0.000000e+00 : f32
    %158 = vector.broadcast %cst_64 : f32 to vector<16x128xf32>
    %159 = arith.maximumf %157, %158 : vector<16x128xf32>
    %cst_65 = arith.constant dense<0.000000e+00> : vector<16x128xf32>
    %160 = tpu.matmul %159, %15, %cst_65 {dimension_numbers = #tpu.dot_dimension_numbers<[1], [0], [0], [1], [0, 0, 1, 1], [], []>} : vector<16x128xf32>, vector<128x128xf32>, vector<16x128xf32> -> vector<16x128xf32>
    %c913 = arith.constant 913 : index
    %c0_66 = arith.constant 0 : index
    %161 = vector.load %arg1[%c913, %c0_66] : memref<920x256xf32, #tpu.memory_space<vmem>>, vector<1x128xf32>
    %162 = vector.broadcast %161 : vector<1x128xf32> to vector<16x128xf32>
    %163 = arith.addf %160, %162 : vector<16x128xf32>
    %164 = tpu.iota {dimensions = array<i32: 1>} : vector<16x128xi32>
    %c5_i32 = arith.constant 5 : i32
    %165 = vector.broadcast %c5_i32 : i32 to vector<16x128xi32>
    %166 = arith.cmpi sge, %164, %165 : vector<16x128xi32>
    %c9_i32 = arith.constant 9 : i32
    %167 = vector.broadcast %c9_i32 : i32 to vector<16x128xi32>
    %168 = arith.cmpi slt, %164, %167 : vector<16x128xi32>
    %169 = arith.andi %166, %168 : vector<16x128xi1>
    %cst_67 = arith.constant -2.000000e+01 : f32
    %cst_68 = arith.constant 2.000000e+00 : f32
    %170 = vector.broadcast %cst_67 : f32 to vector<16x128xf32>
    %171 = arith.maximumf %170, %163 : vector<16x128xf32>
    %172 = vector.broadcast %cst_68 : f32 to vector<16x128xf32>
    %173 = arith.minimumf %172, %171 : vector<16x128xf32>
    %174 = math.exp %173 : vector<16x128xf32>
    %175 = arith.select %169, %174, %163 : vector<16x128xi1>, vector<16x128xf32>
    %176 = arith.addf %83, %175 : vector<16x128xf32>
    %c0_69 = arith.constant 0 : index
    %c0_70 = arith.constant 0 : index
    %177 = vector.load %arg2[%c0_69, %c0_70] : memref<16x128xf32, #tpu.memory_space<vmem>>, vector<16x128xf32>
    tpu.vector_store %arg2[%c0_69, %c0_70], %176 {strides = array<i32>} : memref<16x128xf32, #tpu.memory_space<vmem>>, vector<16x128xf32>,
    return
  }
}

</mosaic_0001>

<bundles_post_ra>
// kernel: a2c_forward.1
= control target key start
LH: loop header
LB: loop body
LE: loop exit
PB: predicated region body
PF: predicated region fallthrough
CT: control target
= control target key end

     0   :  { %7 = vsyncpa [#allocation3], 0  ;;  %s919_s12 = smov [#allocation2]   ;;  %s920_s14 = smov 256   ;;  %s1054_s0 = inlined_call_operand.vmem [shape: f32[16,128], index: 0, kind: input, shape index: {}]   ;;  %s1055_s1 = inlined_call_operand.hbm [shape: f32[920,256], index: 1, kind: input, shape index: {}]   ;;  %s1056_s2 = inlined_call_operand.vmem [shape: f32[16,128], index: 2, kind: output, shape index: {}]  }
   0x1   :  { %s14_s11 = sshll.u32 %s1055_s1, 4  ;;  %s16_s13 = sshll.u32 %s919_s12, 4  ;;  %s15_s11 = int_to_ptr.hbm [resolvable:$true] %s14_s11  ;;  %s17_s13 = int_to_ptr.vmem [resolvable:$true] %s16_s13 }
   0x2   :  { %s921_s15 = smov 16  }
   0x3   :  { %22 = dma.hbm_to_vmem [thread:$0]  %s15_s11, 29440, %s17_s13, [#allocation3], %s920_s14, %s920_s14, %s921_s15  }
   0x4   :  { %917 = dma.done.wait [#allocation3], 29440  }
   0x5   :  { %918 = vsyncadd [#allocation3], 4294937856  ;;  %v49_v0 = vld [vmem:[#allocation2 + $0xf0] sm:$0xff]  ;;  %v48_v1 = vld [vmem:[#allocation2 + $0xe0] sm:$0xff]  ;;  %v29_v31 = vlaneseq  ;;  %v922_v40 = vmov 0.0  }
   0x6   :  { %266 = vmatpush.msra.mxu0 %v49_v0  ;;  %v47_v2 = vld [vmem:[#allocation2 + $0xd0] sm:$0xff]  ;;  %v46_v3 = vld [vmem:[#allocation2 + $0xc0] sm:$0xff]  ;;  %v950_v17 = vld [vmem:[%s1054_s0 + $0x8] sm:$0xff] }
   0x7   :  { %v45_v4 = vld [vmem:[#allocation2 + $0xb0] sm:$0xff]  ;;  %v44_v5 = vld [vmem:[#allocation2 + $0xa0] sm:$0xff]  ;;  %v97_v25 = vld [vmem:[#allocation2 + $0x1f8] sm:$0xff]  ;;  %v955_v34 = vand.u32 127, %v29_v31 }
   0x8   :  { %267 = vmatpush.msra.mxu0 %v48_v1  ;;  %v43_v6 = vld [vmem:[#allocation2 + $0x90] sm:$0xff]  ;;  %v42_v7 = vld [vmem:[#allocation2 + $0x80] sm:$0xff]  ;;  %v95_v26 = vld [vmem:[#allocation2 + $0x1e8] sm:$0xff]  ;;  %365 = vmatpush.msra.mxu2 %v97_v25 }
   0x9   :  { %v41_v8 = vld [vmem:[#allocation2 + $0x70] sm:$0xff]  ;;  %v40_v9 = vld [vmem:[#allocation2 + $0x60] sm:$0xff]  ;;  %v93_v27 = vld [vmem:[#allocation2 + $0x1d8] sm:$0xff]  ;;  %vm31_vm0 = vcmp.lt.s32.totalorder %v955_v34, 17 }
   0xa   :  { %268 = vmatpush.msra.mxu0 %v47_v2  ;;  %v39_v10 = vld [vmem:[#allocation2 + $0x50] sm:$0xff]  ;;  %v38_v11 = vld [vmem:[#allocation2 + $0x40] sm:$0xff]  ;;  %366 = vmatpush.msra.mxu2 %v95_v26  ;;  %v91_v30 = vld [vmem:[#allocation2 + $0x1c8] sm:$0xff]  ;;  %v958_v41 = vsel %vm31_vm0, 1.0, %v922_v40 }
   0xb   :  { %v37_v12 = vld [vmem:[#allocation2 + $0x30] sm:$0xff]  ;;  %v36_v13 = vld [vmem:[#allocation2 + $0x20] sm:$0xff]  ;;  %v89_v32 = vld [vmem:[#allocation2 + $0x1b8] sm:$0xff] }
   0xc   :  { %269 = vmatpush.msra.mxu0 %v46_v3  ;;  %v35_v14 = vld [vmem:[#allocation2 + $0x10] sm:$0xff]  ;;  %v34_v15 = vld [vmem:[#allocation2] sm:$0xff]  ;;  %367 = vmatpush.msra.mxu2 %v93_v27  ;;  %v87_v33 = vld [vmem:[#allocation2 + $0x1a8] sm:$0xff] }
   0xd   :  { %v944_v16 = vld [vmem:[%s1054_s0] sm:$0xff]  ;;  %v96_v28 = vld [vmem:[#allocation2 + $0x1f0] sm:$0xff]  ;;  %v85_v35 = vld [vmem:[#allocation2 + $0x198] sm:$0xff] }
   0xe   :  { %270 = vmatpush.msra.mxu0 %v45_v4  ;;  %v258_v18 = vld [vmem:[#allocation2 + $0x700] ss:$0 sm:$0xff]  ;;  %342 = vmatpush.msra.mxu1 %v96_v28  ;;  %v83_v36 = vld [vmem:[#allocation2 + $0x188] sm:$0xff]  ;;  %v81_v37 = vld [vmem:[#allocation2 + $0x178] sm:$0xff] }
   0xf   :  { %v94_v29 = vld [vmem:[#allocation2 + $0x1e0] sm:$0xff]  ;;  %368 = vmatpush.msra.mxu2 %v91_v30  ;;  %v79_v50 = vld [vmem:[#allocation2 + $0x168] sm:$0xff]  ;;  %v92_v51 = vld [vmem:[#allocation2 + $0x1d0] sm:$0xff] }
  0x10   :  { %271 = vmatpush.msra.mxu0 %v44_v5  ;;  %343 = vmatpush.msra.mxu1 %v94_v29  ;;  %v77_v52 = vld [vmem:[#allocation2 + $0x158] sm:$0xff]  ;;  %v90_v53 = vld [vmem:[#allocation2 + $0x1c0] sm:$0xff]  ;;  %v75_v54 = vld [vmem:[#allocation2 + $0x148] sm:$0xff] }
  0x11   :  { %369 = vmatpush.msra.mxu2 %v89_v32  ;;  %v88_v55 = vld [vmem:[#allocation2 + $0x1b0] sm:$0xff]  ;;  %v73_v56 = vld [vmem:[#allocation2 + $0x138] sm:$0xff]  ;;  %v86_v57 = vld [vmem:[#allocation2 + $0x1a0] sm:$0xff] }
  0x12   :  { %272 = vmatpush.msra.mxu0 %v43_v6  ;;  %344 = vmatpush.msra.mxu1 %v92_v51  ;;  %v71_v58 = vld [vmem:[#allocation2 + $0x128] sm:$0xff]  ;;  %v84_v59 = vld [vmem:[#allocation2 + $0x190] sm:$0xff]  ;;  %v69_v60 = vld [vmem:[#allocation2 + $0x118] sm:$0xff] }
  0x13   :  { %370 = vmatpush.msra.mxu2 %v87_v33  ;;  %v82_v61 = vld [vmem:[#allocation2 + $0x180] sm:$0xff]  ;;  %v67_v62 = vld [vmem:[#allocation2 + $0x108] sm:$0xff]  ;;  %v80_v63 = vld [vmem:[#allocation2 + $0x170] sm:$0xff] }
  0x14   :  { %273 = vmatpush.msra.mxu0 %v42_v7  ;;  %345 = vmatpush.msra.mxu1 %v90_v53  ;;  %v65_v0 = vld [vmem:[#allocation2 + $0xf8] sm:$0xff]  ;;  %v78_v1 = vld [vmem:[#allocation2 + $0x160] sm:$0xff]  ;;  %v64_v2 = vld [vmem:[#allocation2 + $0xe8] sm:$0xff] }
  0x15   :  { %371 = vmatpush.msra.mxu2 %v85_v35  ;;  %v76_v3 = vld [vmem:[#allocation2 + $0x150] sm:$0xff]  ;;  %v63_v4 = vld [vmem:[#allocation2 + $0xd8] sm:$0xff]  ;;  %v74_v5 = vld [vmem:[#allocation2 + $0x140] sm:$0xff] }
  0x16   :  { %274 = vmatpush.msra.mxu0 %v41_v8  ;;  %346 = vmatpush.msra.mxu1 %v88_v55  ;;  %v62_v6 = vld [vmem:[#allocation2 + $0xc8] sm:$0xff]  ;;  %v72_v7 = vld [vmem:[#allocation2 + $0x130] sm:$0xff]  ;;  %v61_v8 = vld [vmem:[#allocation2 + $0xb8] sm:$0xff] }
  0x17   :  { %372 = vmatpush.msra.mxu2 %v83_v36  ;;  %v52_v25 = vld [vmem:[#allocation2 + $0x28] sm:$0xff]  ;;  %v51_v26 = vld [vmem:[#allocation2 + $0x18] sm:$0xff]  ;;  %v177_v40 = vld [vmem:[#allocation2 + $0x4f0] sm:$0xff] }
  0x18   :  { %275 = vmatpush.msra.mxu0 %v40_v9  ;;  %347 = vmatpush.msra.mxu1 %v86_v57  ;;  %v70_v9 = vld [vmem:[#allocation2 + $0x120] sm:$0xff]  ;;  %v50_v29 = vld [vmem:[#allocation2 + $0x8] sm:$0xff] }
  0x19   :  { %373 = vmatpush.msra.mxu2 %v81_v37  ;;  %392 = vmatpush.msra.mxu3 %v177_v40  ;;  %v192_v51 = vld [vmem:[#allocation2 + $0x5e0] sm:$0xff] }
  0x1a   :  { %276 = vmatpush.msra.mxu0 %v39_v10  ;;  %348 = vmatpush.msra.mxu1 %v84_v59  ;;  %v60_v10 = vld [vmem:[#allocation2 + $0xa8] sm:$0xff]  ;;  %v263_v53 = vld [vmem:[#allocation2 + $0x704] ss:$0 sm:$0xff]  ;;  %v173_v59 = vld [vmem:[#allocation2 + $0x4b0] sm:$0xff] }
  0x1b   :  { %374 = vmatpush.msra.mxu2 %v79_v50  ;;  %v175_v50 = vld [vmem:[#allocation2 + $0x4d0] sm:$0xff] }
  0x1c   :  { %277 = vmatpush.msra.mxu0 %v38_v11  ;;  %349 = vmatpush.msra.mxu1 %v82_v61  ;;  %v68_v11 = vld [vmem:[#allocation2 + $0x110] sm:$0xff] }
  0x1d   :  { %375 = vmatpush.msra.mxu2 %v77_v52 }
  0x1e   :  { %278 = vmatpush.msra.mxu0 %v37_v12  ;;  %350 = vmatpush.msra.mxu1 %v80_v63  ;;  %v59_v12 = vld [vmem:[#allocation2 + $0x98] sm:$0xff] }
  0x1f   :  { %376 = vmatpush.msra.mxu2 %v75_v54  ;;  %v191_v54 = vld [vmem:[#allocation2 + $0x5d0] sm:$0xff] }
  0x20   :  { %279 = vmatpush.msra.mxu0 %v36_v13  ;;  %351 = vmatpush.msra.mxu1 %v78_v1  ;;  %v66_v13 = vld [vmem:[#allocation2 + $0x100] sm:$0xff]  ;;  %v171_v1 = vld [vmem:[#allocation2 + $0x490] sm:$0xff] }
  0x21   :  { %377 = vmatpush.msra.mxu2 %v73_v56  ;;  %v174_v56 = vld [vmem:[#allocation2 + $0x4c0] sm:$0xff] }
  0x22   :  { %280 = vmatpush.msra.mxu0 %v35_v14  ;;  %352 = vmatpush.msra.mxu1 %v76_v3  ;;  %v58_v14 = vld [vmem:[#allocation2 + $0x88] sm:$0xff] }
  0x23   :  { %378 = vmatpush.msra.mxu2 %v71_v58 }
  0x24   :  { %281 = vmatpush.msra.mxu0 %v34_v15  ;;  %353 = vmatpush.msra.mxu1 %v74_v5  ;;  %v57_v15 = vld [vmem:[#allocation2 + $0x78] sm:$0xff]  ;;  %v187_v5 = vld [vmem:[#allocation2 + $0x590] sm:$0xff] }
  0x25   :  { %282 = vmatmul.f32.vlgmr.msra.gmra.mxu0 %v944_v16  ;;  %379 = vmatpush.msra.mxu2 %v69_v60  ;;  %v190_v60 = vld [vmem:[#allocation2 + $0x5c0] sm:$0xff] }
  0x26   :  { %354 = vmatpush.msra.mxu1 %v72_v7  ;;  %v169_v7 = vld [vmem:[#allocation2 + $0x470] sm:$0xff] }
  0x27   :  { %380 = vmatpush.msra.mxu2 %v67_v62  ;;  %v189_v62 = vld [vmem:[#allocation2 + $0x5b0] sm:$0xff] }
  0x28   :  { %355 = vmatpush.msra.mxu1 %v70_v9  ;;  %v185_v9 = vld [vmem:[#allocation2 + $0x570] sm:$0xff] }
  0x29   :  { %518 = vmatpush.msrb.mxu2 %v65_v0 }
  0x2a   :  { %356 = vmatpush.msra.mxu1 %v68_v11  ;;  %v184_v11 = vld [vmem:[#allocation2 + $0x560] sm:$0xff] }
  0x2b   :  { %519 = vmatpush.msrb.mxu2 %v64_v2  ;;  %v188_v2 = vld [vmem:[#allocation2 + $0x5a0] sm:$0xff] }
  0x2c   :  { %357 = vmatpush.msra.mxu1 %v66_v13  ;;  %v165_v13 = vld [vmem:[#allocation2 + $0x430] sm:$0xff] }
  0x2d   :  { %285 = vmatmul.f32.gmra.mxu0 %v950_v17  ;;  %520 = vmatpush.msrb.mxu2 %v63_v4  ;;  %v170_v4 = vld [vmem:[#allocation2 + $0x480] sm:$0xff] }
  0x2f   :  { %521 = vmatpush.msrb.mxu2 %v62_v6 }
  0x31   :  { %522 = vmatpush.msrb.mxu2 %v61_v8  ;;  %v186_v8 = vld [vmem:[#allocation2 + $0x580] sm:$0xff] }
  0x33   :  { %523 = vmatpush.msrb.mxu2 %v60_v10  ;;  %v167_v10 = vld [vmem:[#allocation2 + $0x450] sm:$0xff] }
  0x35   :  { %524 = vmatpush.msrb.mxu2 %v59_v12  ;;  %v166_v12 = vld [vmem:[#allocation2 + $0x440] sm:$0xff] }
  0x37   :  { %525 = vmatpush.msrb.mxu2 %v58_v14  ;;  %v164_v14 = vld [vmem:[#allocation2 + $0x420] sm:$0xff] }
  0x39   :  { %526 = vmatpush.msrb.mxu2 %v57_v15  ;;  %v183_v15 = vld [vmem:[#allocation2 + $0x550] sm:$0xff] }
  0xa2   :  { %v283_v19 = vpop.f32.mrf.mxu0 }
  0xa3   :  { %v284_v20 = vadd.f32 %v283_v19, %v258_v18  ;;  %v55_v19 = vld [vmem:[#allocation2 + $0x58] sm:$0xff] }
  0xa5   :  { %v289_v21 = vadd.f32 %v284_v20, %v944_v16 }
  0xa7   :  { %291 = vadd.xlane.f32.xlu0 %v289_v21 }
  0xaa   :  { %v286_v22 = vpop.f32.mrf.mxu0 }
  0xab   :  { %v287_v23 = vadd.f32 %v286_v22, %v258_v18  ;;  %v56_v18 = vld [vmem:[#allocation2 + $0x68] sm:$0xff] }
  0xac   :  { %527 = vmatpush.msrb.mxu2 %v56_v18  ;;  %v54_v22 = vld [vmem:[#allocation2 + $0x48] sm:$0xff]  ;;  %v163_v18 = vld [vmem:[#allocation2 + $0x410] sm:$0xff] }
  0xad   :  { %v290_v24 = vadd.f32 %v287_v23, %v950_v17 }
  0xae   :  { %528 = vmatpush.msrb.mxu2 %v55_v19  ;;  %v182_v19 = vld [vmem:[#allocation2 + $0x540] sm:$0xff] }
  0xaf   :  { %293 = vadd.xlane.f32.xlu0 %v290_v24 }
  0xb0   :  { %529 = vmatpush.msrb.mxu2 %v54_v22  ;;  %v180_v22 = vld [vmem:[#allocation2 + $0x520] sm:$0xff] }
 0x11a   :  { %v292_v38 = vpop.xlane.xlu0 %291 }
 0x11b   :  { %v295_v39 = vmul.f32 0.05882353, %v292_v38 }
 0x11d   :  { %v297_v42 = vsub.f32 %v289_v21, %v295_v39 }
 0x11f   :  { %v961_v43 = vmul.f32 %v958_v41, %v297_v42  ;;  %v176_v42 = vld [vmem:[#allocation2 + $0x4e0] sm:$0xff] }
 0x120   :  { %393 = vmatpush.msra.mxu3 %v176_v42  ;;  %v510_v42 = vld [vmem:[#allocation2 + $0x710] ss:$0 sm:$0xff] }
 0x121   :  { %v301_v44 = vmul.f32 %v961_v43, %v961_v43 }
 0x122   :  { %v294_v45 = vpop.xlane.xlu0 %293  ;;  %394 = vmatpush.msra.mxu3 %v175_v50 }
 0x123   :  { %v296_v46 = vmul.f32 0.05882353, %v294_v45  ;;  %303 = vadd.xlane.f32.xlu1 %v301_v44 }
 0x124   :  { %395 = vmatpush.msra.mxu3 %v174_v56 }
 0x125   :  { %v298_v47 = vsub.f32 %v290_v24, %v296_v46  ;;  %v53_v24 = vld [vmem:[#allocation2 + $0x38] sm:$0xff]  ;;  %v262_v46 = vld [vmem:[#allocation2 + $0x703] ss:$0 sm:$0xff] }
 0x126   :  { %530 = vmatpush.msrb.mxu2 %v53_v24  ;;  %396 = vmatpush.msra.mxu3 %v173_v59  ;;  %v178_v24 = vld [vmem:[#allocation2 + $0x500] sm:$0xff] }
 0x127   :  { %v966_v48 = vmul.f32 %v958_v41, %v298_v47  ;;  %v193_v47 = vld [vmem:[#allocation2 + $0x5f0] sm:$0xff] }
 0x128   :  { %531 = vmatpush.msrb.mxu2 %v52_v25  ;;  %415 = vmatpush.msrb.mxu0 %v193_v47  ;;  %v260_v25 = vld [vmem:[#allocation2 + $0x701] ss:$8 sm:$0x3] }
 0x129   :  { %v302_v49 = vmul.f32 %v966_v48, %v966_v48 }
 0x12a   :  { %532 = vmatpush.msrb.mxu2 %v51_v26  ;;  %416 = vmatpush.msrb.mxu0 %v192_v51  ;;  %v338_v26 = vperm.slane %v260_v25, 0  ;;  %v261_v51 = vld [vmem:[#allocation2 + $0x702] ss:$0 sm:$0xff] }
 0x12b   :  { %305 = vadd.xlane.f32.xlu1 %v302_v49 }
 0x12c   :  { %533 = vmatpush.msrb.mxu2 %v50_v29  ;;  %417 = vmatpush.msrb.mxu0 %v191_v54 }
 0x12e   :  { %418 = vmatpush.msrb.mxu0 %v190_v60 }
 0x130   :  { %419 = vmatpush.msrb.mxu0 %v189_v62 }
 0x132   :  { %420 = vmatpush.msrb.mxu0 %v188_v2 }
 0x134   :  { %421 = vmatpush.msrb.mxu0 %v187_v5  ;;  %v128_v5 = vld [vmem:[#allocation2 + $0x2f0] sm:$0xff] }
 0x136   :  { %422 = vmatpush.msrb.mxu0 %v186_v8  ;;  %v126_v8 = vld [vmem:[#allocation2 + $0x2e0] sm:$0xff] }
 0x138   :  { %423 = vmatpush.msrb.mxu0 %v185_v9  ;;  %v124_v9 = vld [vmem:[#allocation2 + $0x2d0] sm:$0xff] }
 0x13a   :  { %424 = vmatpush.msrb.mxu0 %v184_v11  ;;  %v122_v11 = vld [vmem:[#allocation2 + $0x2c0] sm:$0xff] }
 0x13c   :  { %425 = vmatpush.msrb.mxu0 %v183_v15  ;;  %v119_v15 = vld [vmem:[#allocation2 + $0x2a8] sm:$0xff] }
 0x13e   :  { %426 = vmatpush.msrb.mxu0 %v182_v19  ;;  %v117_v19 = vld [vmem:[#allocation2 + $0x298] sm:$0xff] }
 0x196   :  { %v304_v20 = vpop.xlane.xlu1 %303 }
 0x197   :  { %v307_v21 = vmul.f32 0.05882353, %v304_v20  ;;  %v162_v20 = vld [vmem:[#allocation2 + $0x400] sm:$0xff] }
 0x199   :  { %v309_v23 = vadd.f32 1e-05, %v307_v21  ;;  %v181_v21 = vld [vmem:[#allocation2 + $0x530] sm:$0xff] }
 0x19a   :  { %427 = vmatpush.msrb.mxu0 %v181_v21  ;;  %v115_v21 = vld [vmem:[#allocation2 + $0x288] sm:$0xff] }
 0x19b   :  { %873 = vrsqrt.f32 %v309_v23  ;;  %vm317_vm2 = vweird.f32 %v309_v23 }
 0x19c   :  { %428 = vmatpush.msrb.mxu0 %v180_v22  ;;  %v112_v22 = vld [vmem:[#allocation2 + $0x270] sm:$0xff] }
 0x19e   :  { %v306_v27 = vpop.xlane.xlu1 %305 }
 0x19f   :  { %v308_v28 = vmul.f32 0.05882353, %v306_v27 }
 0x1a1   :  { %v874_v30 = vpop.eup %873  ;;  %v310_v31 = vadd.f32 1e-05, %v308_v28 }
 0x1a2   :  { %v312_v32 = vmul.f32 %v874_v30, %v309_v23  ;;  %vm318_vm1 = vweird.f32 %v874_v30  ;;  %v179_v23 = vld [vmem:[#allocation2 + $0x510] sm:$0xff] }
 0x1a3   :  { %875 = vrsqrt.f32 %v310_v31  ;;  %vm319_vm3 = vmor %vm317_vm2, %vm318_vm1  ;;  %vm327_vm5 = vweird.f32 %v310_v31  ;;  %429 = vmatpush.msrb.mxu0 %v179_v23  ;;  %v113_v23 = vld [vmem:[#allocation2 + $0x278] sm:$0xff] }
 0x1a4   :  { %v313_v33 = vmul.f32 %v874_v30, %v312_v32 }
 0x1a5   :  { %430 = vmatpush.msrb.mxu0 %v178_v24  ;;  %v110_v24 = vld [vmem:[#allocation2 + $0x260] sm:$0xff] }
 0x1a6   :  { %v314_v35 = vmul.f32 0.5, %v313_v33 }
 0x1a8   :  { %v315_v36 = vsub.f32 1.5, %v314_v35 }
 0x1a9   :  { %v876_v37 = vpop.eup %875 }
 0x1aa   :  { %v316_v38 = vmul.f32 %v874_v30, %v315_v36  ;;  %v322_v39 = vmul.f32 %v876_v37, %v310_v31  ;;  %vm328_vm4 = vweird.f32 %v876_v37 }
 0x1ab   :  { %vm329_vm6 = vmor %vm327_vm5, %vm328_vm4 }
 0x1ac   :  { %v320_v44 = vsel %vm319_vm3, %v874_v30, %v316_v38  ;;  %v323_v45 = vmul.f32 %v876_v37, %v322_v39  ;;  %v339_v30 = vperm.slane %v260_v25, 1  ;;  %v111_v25 = vld [vmem:[#allocation2 + $0x268] sm:$0xff] }
 0x1ad   :  { %v331_v49 = vmul.f32 %v320_v44, %v961_v43  ;;  %v172_v43 = vld [vmem:[#allocation2 + $0x4a0] sm:$0xff] }
 0x1ae   :  { %v324_v52 = vmul.f32 0.5, %v323_v45  ;;  %397 = vmatpush.msra.mxu3 %v172_v43 }
 0x1af   :  { %v333_v55 = vmul.f32 %v331_v49, %v262_v46 }
 0x1b0   :  { %v325_v57 = vsub.f32 1.5, %v324_v52  ;;  %398 = vmatpush.msra.mxu3 %v171_v1 }
 0x1b1   :  { %v971_v58 = vadd.f32 %v333_v55, %v263_v53 }
 0x1b2   :  { %v326_v61 = vmul.f32 %v876_v37, %v325_v57  ;;  %399 = vmatpush.msra.mxu3 %v170_v4 }
 0x1b3   :  { %358 = vmatmul.f32.vlgmr.msra.gmra.mxu1 %v971_v58  ;;  %381 = vmatmul.f32.vlgmr.msra.gmra.mxu2 %v971_v58 }
 0x1b4   :  { %v330_v63 = vsel %vm329_vm6, %v876_v37, %v326_v61  ;;  %400 = vmatpush.msra.mxu3 %v169_v7  ;;  %v129_v7 = vld [vmem:[#allocation2 + $0x2f8] sm:$0xff] }
 0x1b5   :  { %v332_v0 = vmul.f32 %v330_v63, %v966_v48  ;;  %v168_v48 = vld [vmem:[#allocation2 + $0x460] sm:$0xff]  ;;  %617 = vmatpush.msra.mxu0 %v129_v7 }
 0x1b6   :  { %401 = vmatpush.msra.mxu3 %v168_v48  ;;  %v127_v48 = vld [vmem:[#allocation2 + $0x2e8] sm:$0xff] }
 0x1b7   :  { %v334_v3 = vmul.f32 %v332_v0, %v262_v46  ;;  %618 = vmatpush.msra.mxu0 %v127_v48  ;;  %v514_v48 = vld [vmem:[#allocation2 + $0x713] ss:$0 sm:$0xff] }
 0x1b8   :  { %402 = vmatpush.msra.mxu3 %v167_v10  ;;  %v125_v10 = vld [vmem:[#allocation2 + $0x2d8] sm:$0xff] }
 0x1b9   :  { %v976_v6 = vadd.f32 %v334_v3, %v263_v53  ;;  %619 = vmatpush.msra.mxu0 %v125_v10 }
 0x1ba   :  { %403 = vmatpush.msra.mxu3 %v166_v12  ;;  %v123_v12 = vld [vmem:[#allocation2 + $0x2c8] sm:$0xff] }
 0x1bb   :  { %361 = vmatmul.f32.gmra.mxu1 %v976_v6  ;;  %384 = vmatmul.f32.gmra.mxu2 %v976_v6 }
 0x1bc   :  { %404 = vmatpush.msra.mxu3 %v165_v13  ;;  %620 = vmatpush.msra.mxu0 %v123_v12  ;;  %v121_v13 = vld [vmem:[#allocation2 + $0x2b8] sm:$0xff] }
 0x1be   :  { %405 = vmatpush.msra.mxu3 %v164_v14  ;;  %621 = vmatpush.msra.mxu0 %v121_v13  ;;  %v118_v14 = vld [vmem:[#allocation2 + $0x2a0] sm:$0xff] }
 0x1c0   :  { %406 = vmatpush.msra.mxu3 %v163_v18  ;;  %622 = vmatpush.msra.mxu0 %v119_v15  ;;  %v116_v18 = vld [vmem:[#allocation2 + $0x290] sm:$0xff] }
 0x1c2   :  { %407 = vmatpush.msra.mxu3 %v162_v20  ;;  %623 = vmatpush.msra.mxu0 %v117_v19  ;;  %v114_v20 = vld [vmem:[#allocation2 + $0x280] sm:$0xff] }
 0x1c3   :  { %534 = vmatmul.f32.vlgmr.msrb.gmra.mxu2 %v944_v16 }
 0x1c4   :  { %594 = vmatpush.msrb.mxu3 %v128_v5  ;;  %624 = vmatpush.msra.mxu0 %v115_v21  ;;  %v139_v21 = vld [vmem:[#allocation2 + $0x390] sm:$0xff] }
 0x1c6   :  { %595 = vmatpush.msrb.mxu3 %v126_v8  ;;  %625 = vmatpush.msra.mxu0 %v113_v23  ;;  %v137_v23 = vld [vmem:[#allocation2 + $0x370] sm:$0xff] }
 0x1c8   :  { %596 = vmatpush.msrb.mxu3 %v124_v9  ;;  %626 = vmatpush.msra.mxu0 %v111_v25  ;;  %v135_v25 = vld [vmem:[#allocation2 + $0x350] sm:$0xff] }
 0x1ca   :  { %597 = vmatpush.msrb.mxu3 %v122_v11  ;;  %v515_v11 = vld [vmem:[#allocation2 + $0x714] ss:$0 sm:$0xff] }
 0x1cb   :  { %537 = vmatmul.f32.gmra.mxu2 %v950_v17 }
 0x230   :  { %v359_v27 = vpop.f32.mrf.mxu1 }
 0x231   :  { %v360_v28 = vadd.f32 %v359_v27, %v338_v26  ;;  %v109_v27 = vld [vmem:[#allocation2 + $0x258] sm:$0xff] }
 0x232   :  { %627 = vmatpush.msra.mxu0 %v109_v27  ;;  %v224_v27 = vld [vmem:[#allocation2 + $0x5e8] sm:$0xff] }
 0x233   :  { %v388_v29 = vmax.f32 %v360_v28, 0.0  ;;  %v106_v28 = vld [vmem:[#allocation2 + $0x240] sm:$0xff] }
 0x235   :  { %408 = vmatmul.f32.vlgmr.msra.gmra.mxu3 %v388_v29  ;;  %v107_v29 = vld [vmem:[#allocation2 + $0x248] sm:$0xff] }
 0x236   :  { %v382_v31 = vpop.f32.mrf.mxu2  ;;  %628 = vmatpush.msra.mxu0 %v107_v29  ;;  %v223_v29 = vld [vmem:[#allocation2 + $0x5d8] sm:$0xff] }
 0x237   :  { %v383_v32 = vadd.f32 %v382_v31, %v339_v30  ;;  %v105_v31 = vld [vmem:[#allocation2 + $0x238] sm:$0xff] }
 0x238   :  { %v362_v33 = vpop.f32.mrf.mxu1  ;;  %629 = vmatpush.msra.mxu0 %v105_v31  ;;  %v222_v31 = vld [vmem:[#allocation2 + $0x5c8] sm:$0xff] }
 0x239   :  { %v389_v35 = vmax.f32 %v383_v32, 0.0  ;;  %v363_v36 = vadd.f32 %v362_v33, %v338_v26  ;;  %v108_v26 = vld [vmem:[#allocation2 + $0x250] sm:$0xff]  ;;  %v102_v32 = vld [vmem:[#allocation2 + $0x220] sm:$0xff]  ;;  %v103_v33 = vld [vmem:[#allocation2 + $0x228] sm:$0xff] }
 0x23a   :  { %630 = vmatpush.msra.mxu0 %v103_v33  ;;  %v221_v33 = vld [vmem:[#allocation2 + $0x5b8] sm:$0xff] }
 0x23b   :  { %v390_v37 = vmax.f32 %v363_v36, 0.0  ;;  %431 = vmatmul.f32.vlgmr.msrb.gmra.mxu0 %v389_v35 }
 0x23d   :  { %411 = vmatmul.f32.gmra.mxu3 %v390_v37  ;;  %v100_v37 = vld [vmem:[#allocation2 + $0x210] sm:$0xff] }
 0x23e   :  { %v385_v38 = vpop.f32.mrf.mxu2 }
 0x23f   :  { %v386_v39 = vadd.f32 %v385_v38, %v339_v30  ;;  %v104_v30 = vld [vmem:[#allocation2 + $0x230] sm:$0xff]  ;;  %v101_v38 = vld [vmem:[#allocation2 + $0x218] sm:$0xff] }
 0x240   :  { %631 = vmatpush.msra.mxu0 %v101_v38  ;;  %v208_v38 = vld [vmem:[#allocation2 + $0x4e8] sm:$0xff] }
 0x241   :  { %v391_v40 = vmax.f32 %v386_v39, 0.0 }
 0x243   :  { %434 = vmatmul.f32.gmra.mxu0 %v391_v40  ;;  %v98_v40 = vld [vmem:[#allocation2 + $0x200] sm:$0xff] }
 0x246   :  { %v535_v44 = vpop.f32.mrf.mxu2 }
 0x247   :  { %v536_v45 = vadd.f32 %v535_v44, %v510_v42 }
 0x249   :  { %v541_v46 = vadd.f32 %v536_v45, %v944_v16 }
 0x24b   :  { %543 = vadd.xlane.f32.xlu2 %v541_v46 }
 0x24e   :  { %v538_v47 = vpop.f32.mrf.mxu2 }
 0x24f   :  { %v539_v49 = vadd.f32 %v538_v47, %v510_v42  ;;  %v99_v42 = vld [vmem:[#allocation2 + $0x208] sm:$0xff] }
 0x250   :  { %632 = vmatpush.msra.mxu0 %v99_v42  ;;  %v218_v42 = vld [vmem:[#allocation2 + $0x588] sm:$0xff] }
 0x251   :  { %v542_v50 = vadd.f32 %v539_v49, %v950_v17 }
 0x253   :  { %545 = vadd.xlane.f32.xlu2 %v542_v50 }
 0x2b8   :  { %v409_v52 = vpop.f32.mrf.mxu3  ;;  %v432_v54 = vpop.f32.mrf.mxu0 }
 0x2b9   :  { %v410_v53 = vadd.f32 %v409_v52, %v261_v51  ;;  %v143_v52 = vld [vmem:[#allocation2 + $0x3d0] sm:$0xff] }
 0x2bb   :  { %v433_v55 = vadd.f32 %v432_v54, %v410_v53 }
 0x2bd   :  { %v985_v56 = vadd.f32 %v433_v55, %v971_v58 }
 0x2be   :  { %v544_v57 = vpop.xlane.xlu2 %543 }
 0x2bf   :  { %v547_v59 = vmul.f32 0.05882353, %v544_v57  ;;  %440 = vadd.xlane.f32.xlu2 %v985_v56  ;;  %v142_v57 = vld [vmem:[#allocation2 + $0x3c0] sm:$0xff] }
 0x2c0   :  { %v412_v16 = vpop.f32.mrf.mxu3  ;;  %v435_v0 = vpop.f32.mrf.mxu0 }
 0x2c1   :  { %v549_v60 = vsub.f32 %v541_v46, %v547_v59  ;;  %v413_v43 = vadd.f32 %v412_v16, %v261_v51  ;;  %v144_v51 = vld [vmem:[#allocation2 + $0x3e0] sm:$0xff] }
 0x2c3   :  { %v989_v61 = vmul.f32 %v958_v41, %v549_v60  ;;  %v436_v1 = vadd.f32 %v435_v0, %v413_v43  ;;  %v141_v43 = vld [vmem:[#allocation2 + $0x3b0] sm:$0xff] }
 0x2c5   :  { %v553_v17 = vmul.f32 %v989_v61, %v989_v61  ;;  %v999_v4 = vadd.f32 %v436_v1, %v976_v6  ;;  %v120_v6 = vld [vmem:[#allocation2 + $0x2b0] sm:$0xff] }
 0x2c6   :  { %v546_v62 = vpop.xlane.xlu2 %545  ;;  %598 = vmatpush.msrb.mxu3 %v120_v6 }
 0x2c7   :  { %v548_v63 = vmul.f32 0.05882353, %v546_v62  ;;  %555 = vadd.xlane.f32.xlu0 %v553_v17 }
 0x2c8   :  { %599 = vmatpush.msrb.mxu3 %v118_v14 }
 0x2c9   :  { %v550_v58 = vsub.f32 %v542_v50, %v548_v63  ;;  %v145_v50 = vld [vmem:[#allocation2 + $0x3f0] sm:$0xff] }
 0x2ca   :  { %600 = vmatpush.msrb.mxu3 %v116_v18  ;;  %487 = vmatpush.msrb.mxu1 %v145_v50  ;;  %v204_v50 = vld [vmem:[#allocation2 + $0x4a8] sm:$0xff] }
 0x2cb   :  { %v994_v2 = vmul.f32 %v958_v41, %v550_v58 }
 0x2cc   :  { %601 = vmatpush.msrb.mxu3 %v114_v20  ;;  %488 = vmatpush.msrb.mxu1 %v144_v51  ;;  %v215_v51 = vld [vmem:[#allocation2 + $0x558] sm:$0xff] }
 0x2cd   :  { %v554_v3 = vmul.f32 %v994_v2, %v994_v2 }
 0x2ce   :  { %602 = vmatpush.msrb.mxu3 %v112_v22  ;;  %489 = vmatpush.msrb.mxu1 %v143_v52  ;;  %v138_v22 = vld [vmem:[#allocation2 + $0x380] sm:$0xff] }
 0x2cf   :  { %557 = vadd.xlane.f32.xlu1 %v554_v3  ;;  %442 = vadd.xlane.f32.xlu0 %v999_v4 }
 0x2d0   :  { %603 = vmatpush.msrb.mxu3 %v110_v24  ;;  %490 = vmatpush.msrb.mxu1 %v142_v57  ;;  %v136_v24 = vld [vmem:[#allocation2 + $0x360] sm:$0xff]  ;;  %v202_v57 = vld [vmem:[#allocation2 + $0x488] sm:$0xff] }
 0x2d2   :  { %604 = vmatpush.msrb.mxu3 %v108_v26  ;;  %491 = vmatpush.msrb.mxu1 %v141_v43  ;;  %v134_v26 = vld [vmem:[#allocation2 + $0x340] sm:$0xff]  ;;  %v200_v43 = vld [vmem:[#allocation2 + $0x468] sm:$0xff] }
 0x2d4   :  { %605 = vmatpush.msrb.mxu3 %v106_v28  ;;  %v133_v28 = vld [vmem:[#allocation2 + $0x330] sm:$0xff] }
 0x2d6   :  { %606 = vmatpush.msrb.mxu3 %v104_v30  ;;  %v132_v30 = vld [vmem:[#allocation2 + $0x320] sm:$0xff] }
 0x2d8   :  { %607 = vmatpush.msrb.mxu3 %v102_v32  ;;  %v131_v32 = vld [vmem:[#allocation2 + $0x310] sm:$0xff] }
 0x2da   :  { %608 = vmatpush.msrb.mxu3 %v100_v37  ;;  %v220_v37 = vld [vmem:[#allocation2 + $0x5a8] sm:$0xff] }
 0x2dc   :  { %609 = vmatpush.msrb.mxu3 %v98_v40  ;;  %v207_v40 = vld [vmem:[#allocation2 + $0x4d8] sm:$0xff] }
 0x332   :  { %v441_v35 = vpop.xlane.xlu2 %440 }
 0x333   :  { %v444_v36 = vmul.f32 0.05882353, %v441_v35  ;;  %v130_v35 = vld [vmem:[#allocation2 + $0x300] sm:$0xff] }
 0x335   :  { %v446_v39 = vsub.f32 %v985_v56, %v444_v36  ;;  %v209_v36 = vld [vmem:[#allocation2 + $0x4f8] sm:$0xff] }
 0x337   :  { %v1004_v44 = vmul.f32 %v958_v41, %v446_v39  ;;  %v219_v39 = vld [vmem:[#allocation2 + $0x598] sm:$0xff] }
 0x339   :  { %v450_v45 = vmul.f32 %v1004_v44, %v1004_v44 }
 0x33a   :  { %v556_v46 = vpop.xlane.xlu0 %555 }
 0x33b   :  { %v559_v47 = vmul.f32 0.05882353, %v556_v46  ;;  %452 = vadd.xlane.f32.xlu1 %v450_v45  ;;  %v206_v45 = vld [vmem:[#allocation2 + $0x4c8] sm:$0xff]  ;;  %v217_v46 = vld [vmem:[#allocation2 + $0x578] sm:$0xff] }
 0x33d   :  { %v561_v49 = vadd.f32 1e-05, %v559_v47  ;;  %v205_v47 = vld [vmem:[#allocation2 + $0x4b8] sm:$0xff] }
 0x33f   :  { %877 = vrsqrt.f32 %v561_v49  ;;  %vm569_vm8 = vweird.f32 %v561_v49 }
 0x342   :  { %v558_v53 = vpop.xlane.xlu1 %557  ;;  %v443_v54 = vpop.xlane.xlu0 %442 }
 0x343   :  { %v560_v55 = vmul.f32 0.05882353, %v558_v53  ;;  %v445_v56 = vmul.f32 0.05882353, %v443_v54  ;;  %v203_v54 = vld [vmem:[#allocation2 + $0x498] sm:$0xff] }
 0x345   :  { %v878_v59 = vpop.eup %877  ;;  %v562_v60 = vadd.f32 1e-05, %v560_v55  ;;  %v447_v16 = vsub.f32 %v999_v4, %v445_v56  ;;  %v214_v55 = vld [vmem:[#allocation2 + $0x548] sm:$0xff] }
 0x346   :  { %v564_v17 = vmul.f32 %v878_v59, %v561_v49  ;;  %vm570_vm7 = vweird.f32 %v878_v59  ;;  %v216_v49 = vld [vmem:[#allocation2 + $0x568] sm:$0xff] }
 0x347   :  { %879 = vrsqrt.f32 %v562_v60  ;;  %v1010_v62 = vmul.f32 %v958_v41, %v447_v16  ;;  %vm571_vm9 = vmor %vm569_vm8, %vm570_vm7  ;;  %vm579_vm11 = vweird.f32 %v562_v60  ;;  %v212_v16 = vld [vmem:[#allocation2 + $0x528] sm:$0xff] }
 0x348   :  { %v565_v63 = vmul.f32 %v878_v59, %v564_v17  ;;  %v211_v17 = vld [vmem:[#allocation2 + $0x518] sm:$0xff] }
 0x349   :  { %v451_v0 = vmul.f32 %v1010_v62, %v1010_v62 }
 0x34a   :  { %v566_v1 = vmul.f32 0.5, %v565_v63  ;;  %v199_v63 = vld [vmem:[#allocation2 + $0x458] sm:$0xff] }
 0x34b   :  { %454 = vadd.xlane.f32.xlu2 %v451_v0  ;;  %v210_v0 = vld [vmem:[#allocation2 + $0x508] sm:$0xff] }
 0x34c   :  { %v567_v58 = vsub.f32 1.5, %v566_v1 }
 0x34d   :  { %v880_v3 = vpop.eup %879 }
 0x34e   :  { %v568_v5 = vmul.f32 %v878_v59, %v567_v58  ;;  %v574_v4 = vmul.f32 %v880_v3, %v562_v60  ;;  %vm580_vm10 = vweird.f32 %v880_v3  ;;  %v201_v60 = vld [vmem:[#allocation2 + $0x478] sm:$0xff]  ;;  %v198_v58 = vld [vmem:[#allocation2 + $0x448] sm:$0xff] }
 0x34f   :  { %vm581_vm12 = vmor %vm579_vm11, %vm580_vm10  ;;  %vm815_vm10 = vcmp.lt.s32.totalorder %v955_v34, 9 }
 0x350   :  { %v572_v7 = vsel %vm571_vm9, %v878_v59, %v568_v5  ;;  %v575_v8 = vmul.f32 %v880_v3, %v574_v4  ;;  %v213_v59 = vld [vmem:[#allocation2 + $0x538] sm:$0xff]  ;;  %vm814_vm9 = vcmp.ge.s32.totalorder %v955_v34, 5 }
 0x351   :  { %v583_v9 = vmul.f32 %v572_v7, %v989_v61  ;;  %v140_v61 = vld [vmem:[#allocation2 + $0x3a0] sm:$0xff]  ;;  %v197_v5 = vld [vmem:[#allocation2 + $0x438] sm:$0xff]  ;;  %v196_v7 = vld [vmem:[#allocation2 + $0x428] sm:$0xff] }
 0x352   :  { %v576_v10 = vmul.f32 0.5, %v575_v8  ;;  %492 = vmatpush.msrb.mxu1 %v140_v61  ;;  %v265_v61 = vld [vmem:[#allocation2 + $0x706] ss:$0 sm:$0xff]  ;;  %vm816_vm11 = vmand %vm814_vm9, %vm815_vm10 }
 0x353   :  { %v585_v12 = vmul.f32 %v583_v9, %v514_v48 }
 0x354   :  { %v577_v6 = vsub.f32 1.5, %v576_v10  ;;  %493 = vmatpush.msrb.mxu1 %v139_v21  ;;  %v195_v10 = vld [vmem:[#allocation2 + $0x418] sm:$0xff] }
 0x355   :  { %v1015_v13 = vadd.f32 %v585_v12, %v515_v11 }
 0x356   :  { %v578_v14 = vmul.f32 %v880_v3, %v577_v6  ;;  %494 = vmatpush.msrb.mxu1 %v138_v22  ;;  %v194_v6 = vld [vmem:[#allocation2 + $0x408] sm:$0xff] }
 0x357   :  { %610 = vmatmul.f32.vlgmr.msrb.gmra.mxu3 %v1015_v13  ;;  %633 = vmatmul.f32.vlgmr.msra.gmra.mxu0 %v1015_v13 }
 0x358   :  { %v582_v15 = vsel %vm581_vm12, %v880_v3, %v578_v14  ;;  %495 = vmatpush.msrb.mxu1 %v137_v23 }
 0x359   :  { %v584_v18 = vmul.f32 %v582_v15, %v994_v2  ;;  %v225_v2 = vld [vmem:[#allocation2 + $0x5f8] sm:$0xff] }
 0x35a   :  { %496 = vmatpush.msrb.mxu1 %v136_v24  ;;  %667 = vmatpush.msra.mxu2 %v225_v2 }
 0x35b   :  { %v586_v19 = vmul.f32 %v584_v18, %v514_v48  ;;  %v264_v18 = vld [vmem:[#allocation2 + $0x705] ss:$0 sm:$0xff] }
 0x35c   :  { %497 = vmatpush.msrb.mxu1 %v135_v25  ;;  %668 = vmatpush.msra.mxu2 %v224_v27 }
 0x35d   :  { %v1020_v20 = vadd.f32 %v586_v19, %v515_v11 }
 0x35e   :  { %498 = vmatpush.msrb.mxu1 %v134_v26  ;;  %669 = vmatpush.msra.mxu2 %v223_v29  ;;  %v512_v26 = vld [vmem:[#allocation2 + $0x711] ss:$8 sm:$0x3] }
 0x35f   :  { %613 = vmatmul.f32.gmra.mxu3 %v1020_v20  ;;  %636 = vmatmul.f32.gmra.mxu0 %v1020_v20 }
 0x360   :  { %499 = vmatpush.msrb.mxu1 %v133_v28  ;;  %670 = vmatpush.msra.mxu2 %v222_v31  ;;  %v591_v28 = vperm.slane %v512_v26, 1 }
 0x362   :  { %500 = vmatpush.msrb.mxu1 %v132_v30  ;;  %671 = vmatpush.msra.mxu2 %v221_v33 }
 0x364   :  { %501 = vmatpush.msrb.mxu1 %v131_v32  ;;  %672 = vmatpush.msra.mxu2 %v220_v37 }
 0x366   :  { %502 = vmatpush.msrb.mxu1 %v130_v35  ;;  %673 = vmatpush.msra.mxu2 %v219_v39 }
 0x368   :  { %644 = vmatpush.msra.mxu1 %v209_v36  ;;  %674 = vmatpush.msra.mxu2 %v218_v42  ;;  %v590_v36 = vperm.slane %v512_v26, 0  ;;  %v241_v26 = vld [vmem:[#allocation2 + $0x6f0] sm:$0xff] }
 0x369   :  { %765 = vmatpush.msrb.mxu0 %v241_v26 }
 0x36a   :  { %645 = vmatpush.msra.mxu1 %v208_v38  ;;  %675 = vmatpush.msra.mxu2 %v217_v46 }
 0x36c   :  { %646 = vmatpush.msra.mxu1 %v207_v40  ;;  %676 = vmatpush.msra.mxu2 %v216_v49 }
 0x36e   :  { %647 = vmatpush.msra.mxu1 %v206_v45  ;;  %677 = vmatpush.msra.mxu2 %v215_v51 }
 0x370   :  { %648 = vmatpush.msra.mxu1 %v205_v47  ;;  %678 = vmatpush.msra.mxu2 %v214_v55 }
 0x372   :  { %649 = vmatpush.msra.mxu1 %v204_v50  ;;  %679 = vmatpush.msra.mxu2 %v213_v59 }
 0x374   :  { %650 = vmatpush.msra.mxu1 %v203_v54  ;;  %680 = vmatpush.msra.mxu2 %v212_v16 }
 0x376   :  { %651 = vmatpush.msra.mxu1 %v202_v57  ;;  %681 = vmatpush.msra.mxu2 %v211_v17 }
 0x378   :  { %652 = vmatpush.msra.mxu1 %v201_v60  ;;  %682 = vmatpush.msra.mxu2 %v210_v0  ;;  %v160_v0 = vld [vmem:[#allocation2 + $0x3e8] sm:$0xff] }
 0x37a   :  { %653 = vmatpush.msra.mxu1 %v200_v43  ;;  %837 = vmatpush.msrb.mxu2 %v241_v26  ;;  %v244_v26 = vld [vmem:[#allocation2 + $0x628] sm:$0xff] }
 0x37c   :  { %654 = vmatpush.msra.mxu1 %v199_v63  ;;  %v161_v63 = vld [vmem:[#allocation2 + $0x3f8] sm:$0xff] }
 0x37d   :  { %739 = vmatpush.msra.mxu3 %v161_v63  ;;  %v229_v63 = vld [vmem:[#allocation2 + $0x630] sm:$0xff] }
 0x37e   :  { %655 = vmatpush.msra.mxu1 %v198_v58 }
 0x37f   :  { %740 = vmatpush.msra.mxu3 %v160_v0 }
 0x380   :  { %656 = vmatpush.msra.mxu1 %v197_v5 }
 0x382   :  { %657 = vmatpush.msra.mxu1 %v196_v7 }
 0x384   :  { %658 = vmatpush.msra.mxu1 %v195_v10  ;;  %v158_v10 = vld [vmem:[#allocation2 + $0x3c8] sm:$0xff] }
 0x386   :  { %659 = vmatpush.msra.mxu1 %v194_v6  ;;  %v155_v6 = vld [vmem:[#allocation2 + $0x398] sm:$0xff] }
 0x3ae   :  { %v453_v52 = vpop.xlane.xlu1 %452 }
 0x3af   :  { %v456_v53 = vmul.f32 0.05882353, %v453_v52  ;;  %v513_v52 = vld [vmem:[#allocation2 + $0x712] ss:$0 sm:$0xff] }
 0x3b1   :  { %v458_v56 = vadd.f32 1e-05, %v456_v53 }
 0x3b3   :  { %881 = vrsqrt.f32 %v458_v56  ;;  %vm466_vm14 = vweird.f32 %v458_v56 }
 0x3b9   :  { %v882_v1 = vpop.eup %881 }
 0x3ba   :  { %v461_v3 = vmul.f32 %v882_v1, %v458_v56  ;;  %vm467_vm13 = vweird.f32 %v882_v1 }
 0x3bb   :  { %vm468_vm15 = vmor %vm466_vm14, %vm467_vm13 }
 0x3bc   :  { %v462_v4 = vmul.f32 %v882_v1, %v461_v3 }
 0x3be   :  { %v463_v8 = vmul.f32 0.5, %v462_v4  ;;  %v455_v48 = vpop.xlane.xlu2 %454 }
 0x3bf   :  { %v457_v9 = vmul.f32 0.05882353, %v455_v48 }
 0x3c0   :  { %v464_v11 = vsub.f32 1.5, %v463_v8 }
 0x3c1   :  { %v459_v12 = vadd.f32 1e-05, %v457_v9  ;;  %v159_v9 = vld [vmem:[#allocation2 + $0x3d8] sm:$0xff] }
 0x3c2   :  { %v465_v14 = vmul.f32 %v882_v1, %v464_v11  ;;  %741 = vmatpush.msra.mxu3 %v159_v9  ;;  %v157_v11 = vld [vmem:[#allocation2 + $0x3b8] sm:$0xff] }
 0x3c3   :  { %883 = vrsqrt.f32 %v459_v12  ;;  %vm476_vm1 = vweird.f32 %v459_v12  ;;  %v255_v9 = vld [vmem:[#allocation2 + $0x6d8] sm:$0xff] }
 0x3c4   :  { %v469_v15 = vsel %vm468_vm15, %v882_v1, %v465_v14  ;;  %742 = vmatpush.msra.mxu3 %v158_v10  ;;  %v154_v14 = vld [vmem:[#allocation2 + $0x388] sm:$0xff]  ;;  %v253_v10 = vld [vmem:[#allocation2 + $0x6b8] sm:$0xff] }
 0x3c5   :  { %v480_v19 = vmul.f32 %v469_v15, %v1004_v44  ;;  %v153_v15 = vld [vmem:[#allocation2 + $0x378] sm:$0xff] }
 0x3c6   :  { %743 = vmatpush.msra.mxu3 %v157_v11  ;;  %v252_v11 = vld [vmem:[#allocation2 + $0x6a8] sm:$0xff] }
 0x3c7   :  { %v482_v21 = vmul.f32 %v480_v19, %v264_v18  ;;  %v150_v19 = vld [vmem:[#allocation2 + $0x348] sm:$0xff] }
 0x3c9   :  { %v884_v22 = vpop.eup %883  ;;  %v484_v23 = vadd.f32 %v482_v21, %v265_v61  ;;  %v148_v21 = vld [vmem:[#allocation2 + $0x328] sm:$0xff] }
 0x3ca   :  { %v471_v24 = vmul.f32 %v884_v22, %v459_v12  ;;  %vm477_vm0 = vweird.f32 %v884_v22  ;;  %v156_v12 = vld [vmem:[#allocation2 + $0x3a8] sm:$0xff] }
 0x3cb   :  { %503 = vmatmul.f32.vlgmr.msrb.gmra.mxu1 %v484_v23  ;;  %vm478_vm2 = vmor %vm476_vm1, %vm477_vm0  ;;  %744 = vmatpush.msra.mxu3 %v156_v12  ;;  %v146_v23 = vld [vmem:[#allocation2 + $0x308] sm:$0xff]  ;;  %v251_v12 = vld [vmem:[#allocation2 + $0x698] sm:$0xff] }
 0x3cc   :  { %v472_v25 = vmul.f32 %v884_v22, %v471_v24 }
 0x3cd   :  { %745 = vmatpush.msra.mxu3 %v155_v6  ;;  %v250_v6 = vld [vmem:[#allocation2 + $0x688] sm:$0xff] }
 0x3ce   :  { %v473_v2 = vmul.f32 0.5, %v472_v25 }
 0x3cf   :  { %746 = vmatpush.msra.mxu3 %v154_v14  ;;  %v249_v14 = vld [vmem:[#allocation2 + $0x678] sm:$0xff] }
 0x3d0   :  { %v474_v27 = vsub.f32 1.5, %v473_v2 }
 0x3d1   :  { %747 = vmatpush.msra.mxu3 %v153_v15  ;;  %v248_v15 = vld [vmem:[#allocation2 + $0x668] sm:$0xff] }
 0x3d2   :  { %v475_v29 = vmul.f32 %v884_v22, %v474_v27  ;;  %v240_v27 = vld [vmem:[#allocation2 + $0x6e0] sm:$0xff] }
 0x3d3   :  { %766 = vmatpush.msrb.mxu0 %v240_v27  ;;  %838 = vmatpush.msrb.mxu2 %v240_v27  ;;  %v243_v27 = vld [vmem:[#allocation2 + $0x618] sm:$0xff] }
 0x3d4   :  { %v634_v30 = vpop.f32.mrf.mxu0  ;;  %v479_v31 = vsel %vm478_vm2, %v884_v22, %v475_v29  ;;  %v147_v22 = vld [vmem:[#allocation2 + $0x318] sm:$0xff] }
 0x3d5   :  { %v635_v32 = vadd.f32 %v634_v30, %v591_v28  ;;  %v481_v44 = vmul.f32 %v479_v31, %v1010_v62  ;;  %v238_v31 = vld [vmem:[#allocation2 + $0x6c0] sm:$0xff] }
 0x3d7   :  { %v641_v33 = vmax.f32 %v635_v32, 0.0  ;;  %v483_v35 = vmul.f32 %v481_v44, %v264_v18  ;;  %v151_v18 = vld [vmem:[#allocation2 + $0x358] sm:$0xff] }
 0x3d9   :  { %683 = vmatmul.f32.vlgmr.msra.gmra.mxu2 %v641_v33  ;;  %v485_v37 = vadd.f32 %v483_v35, %v265_v61  ;;  %v149_v61 = vld [vmem:[#allocation2 + $0x338] sm:$0xff]  ;;  %v237_v33 = vld [vmem:[#allocation2 + $0x6b0] sm:$0xff] }
 0x3da   :  { %v611_v38 = vpop.f32.mrf.mxu3 }
 0x3db   :  { %506 = vmatmul.f32.gmra.mxu1 %v485_v37  ;;  %v612_v40 = vadd.f32 %v611_v38, %v590_v36  ;;  %v235_v38 = vld [vmem:[#allocation2 + $0x690] sm:$0xff] }
 0x3dc   :  { %v637_v39 = vpop.f32.mrf.mxu0 }
 0x3dd   :  { %v638_v42 = vadd.f32 %v637_v39, %v591_v28  ;;  %v640_v46 = vmax.f32 %v612_v40, 0.0  ;;  %v239_v28 = vld [vmem:[#allocation2 + $0x6d0] sm:$0xff]  ;;  %v234_v40 = vld [vmem:[#allocation2 + $0x680] sm:$0xff] }
 0x3de   :  { %767 = vmatpush.msrb.mxu0 %v239_v28  ;;  %839 = vmatpush.msrb.mxu2 %v239_v28  ;;  %v242_v28 = vld [vmem:[#allocation2 + $0x608] sm:$0xff] }
 0x3df   :  { %v643_v45 = vmax.f32 %v638_v42, 0.0 }
 0x3e0   :  { %768 = vmatpush.msrb.mxu0 %v238_v31  ;;  %840 = vmatpush.msrb.mxu2 %v238_v31 }
 0x3e1   :  { %686 = vmatmul.f32.gmra.mxu2 %v643_v45 }
 0x3e2   :  { %v614_v47 = vpop.f32.mrf.mxu3  ;;  %769 = vmatpush.msrb.mxu0 %v237_v33  ;;  %841 = vmatpush.msrb.mxu2 %v237_v33 }
 0x3e3   :  { %660 = vmatmul.f32.vlgmr.msra.gmra.mxu1 %v640_v46  ;;  %v615_v49 = vadd.f32 %v614_v47, %v590_v36  ;;  %v236_v36 = vld [vmem:[#allocation2 + $0x6a0] sm:$0xff]  ;;  %v233_v46 = vld [vmem:[#allocation2 + $0x670] sm:$0xff] }
 0x3e4   :  { %770 = vmatpush.msrb.mxu0 %v236_v36  ;;  %842 = vmatpush.msrb.mxu2 %v236_v36  ;;  %v790_v36 = vld [vmem:[#allocation2 + $0x721] ss:$0 sm:$0xff] }
 0x3e5   :  { %v642_v50 = vmax.f32 %v615_v49, 0.0 }
 0x3e6   :  { %771 = vmatpush.msrb.mxu0 %v235_v38  ;;  %843 = vmatpush.msrb.mxu2 %v235_v38 }
 0x3e8   :  { %772 = vmatpush.msrb.mxu0 %v234_v40  ;;  %844 = vmatpush.msrb.mxu2 %v234_v40 }
 0x3ea   :  { %773 = vmatpush.msrb.mxu0 %v233_v46  ;;  %845 = vmatpush.msrb.mxu2 %v233_v46 }
 0x3eb   :  { %663 = vmatmul.f32.gmra.mxu1 %v642_v50  ;;  %v232_v50 = vld [vmem:[#allocation2 + $0x660] sm:$0xff] }
 0x3ec   :  { %774 = vmatpush.msrb.mxu0 %v232_v50  ;;  %846 = vmatpush.msrb.mxu2 %v232_v50 }
 0x448   :  { %v1026_v51 = vpop.f32.mrf.mxu1 }
 0x458   :  { %v1028_v62 = vpop.f32.mrf.mxu1 }
 0x45c   :  { %v684_v53 = vpop.f32.mrf.mxu2 }
 0x460   :  { %v661_v54 = vpop.f32.mrf.mxu1 }
 0x461   :  { %v662_v55 = vadd.f32 %v661_v54, %v513_v52  ;;  %v516_v54 = vld [vmem:[#allocation2 + $0x715] ss:$0 sm:$0xff] }
 0x463   :  { %v685_v56 = vadd.f32 %v684_v53, %v662_v55 }
 0x464   :  { %v687_v16 = vpop.f32.mrf.mxu2 }
 0x465   :  { %v690_v57 = vadd.f32 %v685_v56, %v1015_v13  ;;  %v231_v56 = vld [vmem:[#allocation2 + $0x650] sm:$0xff] }
 0x466   :  { %775 = vmatpush.msrb.mxu0 %v231_v56  ;;  %847 = vmatpush.msrb.mxu2 %v231_v56 }
 0x467   :  { %692 = vadd.xlane.f32.xlu0 %v690_v57 }
 0x468   :  { %v664_v59 = vpop.f32.mrf.mxu1 }
 0x469   :  { %v665_v60 = vadd.f32 %v664_v59, %v513_v52  ;;  %v517_v59 = vld [vmem:[#allocation2 + $0x716] ss:$0 sm:$0xff] }
 0x46b   :  { %v688_v43 = vadd.f32 %v687_v16, %v665_v60  ;;  %v230_v16 = vld [vmem:[#allocation2 + $0x640] sm:$0xff] }
 0x46c   :  { %776 = vmatpush.msrb.mxu0 %v230_v16  ;;  %848 = vmatpush.msrb.mxu2 %v230_v16 }
 0x46d   :  { %v691_v17 = vadd.f32 %v688_v43, %v1020_v20 }
 0x46e   :  { %777 = vmatpush.msrb.mxu0 %v229_v63  ;;  %849 = vmatpush.msrb.mxu2 %v229_v63 }
 0x46f   :  { %694 = vadd.xlane.f32.xlu1 %v691_v17 }
 0x4da   :  { %v693_v1 = vpop.xlane.xlu0 %692 }
 0x4db   :  { %v696_v58 = vmul.f32 0.05882353, %v693_v1 }
 0x4dd   :  { %v698_v3 = vsub.f32 %v690_v57, %v696_v58 }
 0x4df   :  { %v1033_v5 = vmul.f32 %v958_v41, %v698_v3 }
 0x4e1   :  { %v702_v13 = vmul.f32 %v1033_v5, %v1033_v5 }
 0x4e2   :  { %v695_v4 = vpop.xlane.xlu1 %694 }
 0x4e3   :  { %v697_v7 = vmul.f32 0.05882353, %v695_v4  ;;  %704 = vadd.xlane.f32.xlu2 %v702_v13  ;;  %v228_v13 = vld [vmem:[#allocation2 + $0x620] sm:$0xff]  ;;  %v227_v4 = vld [vmem:[#allocation2 + $0x610] sm:$0xff] }
 0x4e4   :  { %778 = vmatpush.msrb.mxu0 %v228_v13  ;;  %850 = vmatpush.msrb.mxu2 %v228_v13 }
 0x4e5   :  { %v699_v8 = vsub.f32 %v691_v17, %v697_v7  ;;  %v226_v7 = vld [vmem:[#allocation2 + $0x600] sm:$0xff] }
 0x4e6   :  { %779 = vmatpush.msrb.mxu0 %v227_v4  ;;  %851 = vmatpush.msrb.mxu2 %v227_v4 }
 0x4e7   :  { %v1038_v20 = vmul.f32 %v958_v41, %v699_v8  ;;  %v152_v41 = vld [vmem:[#allocation2 + $0x368] sm:$0xff]  ;;  %v257_v8 = vld [vmem:[#allocation2 + $0x6f8] sm:$0xff] }
 0x4e8   :  { %748 = vmatpush.msra.mxu3 %v152_v41  ;;  %780 = vmatpush.msrb.mxu0 %v226_v7  ;;  %v738_v41 = vld [vmem:[#allocation2 + $0x717] ss:$0 sm:$0xff] }
 0x4e9   :  { %v703_v48 = vmul.f32 %v1038_v20, %v1038_v20  ;;  %852 = vmatpush.msrb.mxu2 %v226_v7  ;;  %791 = vmatpush.msrb.mxu1 %v257_v8 }
 0x4ea   :  { %749 = vmatpush.msra.mxu3 %v151_v18  ;;  %v247_v18 = vld [vmem:[#allocation2 + $0x658] sm:$0xff] }
 0x4eb   :  { %706 = vadd.xlane.f32.xlu0 %v703_v48  ;;  %v256_v48 = vld [vmem:[#allocation2 + $0x6e8] sm:$0xff] }
 0x4ec   :  { %750 = vmatpush.msra.mxu3 %v150_v19  ;;  %792 = vmatpush.msrb.mxu1 %v256_v48 }
 0x4ee   :  { %751 = vmatpush.msra.mxu3 %v149_v61  ;;  %793 = vmatpush.msrb.mxu1 %v255_v9 }
 0x4f0   :  { %752 = vmatpush.msra.mxu3 %v148_v21  ;;  %v246_v21 = vld [vmem:[#allocation2 + $0x648] sm:$0xff] }
 0x4f2   :  { %753 = vmatpush.msra.mxu3 %v147_v22 }
 0x4f4   :  { %754 = vmatpush.msra.mxu3 %v146_v23  ;;  %v245_v23 = vld [vmem:[#allocation2 + $0x638] sm:$0xff] }
 0x4f6   :  { %853 = vmatpush.msrb.mxu3 %v257_v8 }
 0x4f8   :  { %854 = vmatpush.msrb.mxu3 %v256_v48 }
 0x4fa   :  { %855 = vmatpush.msrb.mxu3 %v255_v9 }
 0x556   :  { %v705_v24 = vpop.xlane.xlu2 %704 }
 0x557   :  { %v708_v25 = vmul.f32 0.05882353, %v705_v24 }
 0x559   :  { %v710_v2 = vadd.f32 1e-05, %v708_v25 }
 0x55b   :  { %885 = vrsqrt.f32 %v710_v2  ;;  %vm718_vm4 = vweird.f32 %v710_v2 }
 0x55e   :  { %v707_v29 = vpop.xlane.xlu0 %706 }
 0x55f   :  { %v709_v30 = vmul.f32 0.05882353, %v707_v29  ;;  %v764_v29 = vld [vmem:[#allocation2 + $0x720] ss:$0 sm:$0xff] }
 0x561   :  { %v886_v32 = vpop.eup %885  ;;  %v711_v44 = vadd.f32 1e-05, %v709_v30 }
 0x562   :  { %v713_v35 = vmul.f32 %v886_v32, %v710_v2  ;;  %vm719_vm3 = vweird.f32 %v886_v32 }
 0x563   :  { %887 = vrsqrt.f32 %v711_v44  ;;  %vm720_vm5 = vmor %vm718_vm4, %vm719_vm3  ;;  %vm728_vm7 = vweird.f32 %v711_v44 }
 0x564   :  { %v714_v37 = vmul.f32 %v886_v32, %v713_v35 }
 0x566   :  { %v715_v39 = vmul.f32 0.5, %v714_v37 }
 0x568   :  { %v716_v42 = vsub.f32 1.5, %v715_v39 }
 0x569   :  { %v888_v45 = vpop.eup %887 }
 0x56a   :  { %v717_v47 = vmul.f32 %v886_v32, %v716_v42  ;;  %v723_v49 = vmul.f32 %v888_v45, %v711_v44  ;;  %vm729_vm6 = vweird.f32 %v888_v45 }
 0x56b   :  { %vm730_vm8 = vmor %vm728_vm7, %vm729_vm6 }
 0x56c   :  { %v721_v52 = vsel %vm720_vm5, %v886_v32, %v717_v47  ;;  %v724_v53 = vmul.f32 %v888_v45, %v723_v49 }
 0x56d   :  { %v732_v55 = vmul.f32 %v721_v52, %v1033_v5 }
 0x56e   :  { %v725_v57 = vmul.f32 0.5, %v724_v53 }
 0x56f   :  { %v734_v60 = vmul.f32 %v732_v55, %v516_v54 }
 0x570   :  { %v726_v43 = vsub.f32 1.5, %v725_v57 }
 0x571   :  { %v736_v17 = vadd.f32 %v734_v60, %v517_v59 }
 0x572   :  { %v727_v0 = vmul.f32 %v888_v45, %v726_v43 }
 0x573   :  { %755 = vmatmul.f32.vlgmr.msra.gmra.mxu3 %v736_v17 }
 0x574   :  { %v731_v1 = vsel %vm730_vm8, %v888_v45, %v727_v0  ;;  %v486_v45 = vld [vmem:[#allocation2 + $0x707] ss:$0 sm:$0xff] }
 0x575   :  { %v733_v58 = vmul.f32 %v731_v1, %v1038_v20  ;;  %v254_v20 = vld [vmem:[#allocation2 + $0x6c8] sm:$0xff]  ;;  %v505_v47 = vadd.f32 %v1026_v51, %v486_v45  ;;  %v508_v34 = vadd.f32 %v1028_v62, %v486_v45 }
 0x576   :  { %794 = vmatpush.msrb.mxu1 %v254_v20  ;;  %856 = vmatpush.msrb.mxu3 %v254_v20 }
 0x577   :  { %v735_v3 = vmul.f32 %v733_v58, %v516_v54 }
 0x578   :  { %795 = vmatpush.msrb.mxu1 %v253_v10  ;;  %857 = vmatpush.msrb.mxu3 %v253_v10 }
 0x579   :  { %v737_v5 = vadd.f32 %v735_v3, %v517_v59 }
 0x57a   :  { %796 = vmatpush.msrb.mxu1 %v252_v11  ;;  %858 = vmatpush.msrb.mxu3 %v252_v11 }
 0x57b   :  { %758 = vmatmul.f32.gmra.mxu3 %v737_v5 }
 0x57c   :  { %797 = vmatpush.msrb.mxu1 %v251_v12  ;;  %859 = vmatpush.msrb.mxu3 %v251_v12 }
 0x57e   :  { %798 = vmatpush.msrb.mxu1 %v250_v6  ;;  %860 = vmatpush.msrb.mxu3 %v250_v6 }
 0x580   :  { %799 = vmatpush.msrb.mxu1 %v249_v14  ;;  %861 = vmatpush.msrb.mxu3 %v249_v14 }
 0x582   :  { %800 = vmatpush.msrb.mxu1 %v248_v15  ;;  %862 = vmatpush.msrb.mxu3 %v248_v15 }
 0x584   :  { %801 = vmatpush.msrb.mxu1 %v247_v18  ;;  %863 = vmatpush.msrb.mxu3 %v247_v18 }
 0x586   :  { %802 = vmatpush.msrb.mxu1 %v246_v21  ;;  %864 = vmatpush.msrb.mxu3 %v246_v21 }
 0x588   :  { %803 = vmatpush.msrb.mxu1 %v245_v23  ;;  %865 = vmatpush.msrb.mxu3 %v245_v23 }
 0x58a   :  { %804 = vmatpush.msrb.mxu1 %v244_v26  ;;  %866 = vmatpush.msrb.mxu3 %v244_v26 }
 0x58c   :  { %805 = vmatpush.msrb.mxu1 %v243_v27  ;;  %867 = vmatpush.msrb.mxu3 %v243_v27 }
 0x58e   :  { %806 = vmatpush.msrb.mxu1 %v242_v28  ;;  %868 = vmatpush.msrb.mxu3 %v242_v28 }
 0x5f6   :  { %v756_v19 = vpop.f32.mrf.mxu3 }
 0x5f7   :  { %v757_v61 = vadd.f32 %v756_v19, %v738_v41 }
 0x5f9   :  { %v762_v22 = vmax.f32 %v757_v61, 0.0 }
 0x5fb   :  { %781 = vmatmul.f32.vlgmr.msrb.gmra.mxu0 %v762_v22 }
 0x5fe   :  { %v759_v24 = vpop.f32.mrf.mxu3 }
 0x5ff   :  { %v760_v25 = vadd.f32 %v759_v24, %v738_v41 }
 0x601   :  { %v763_v2 = vmax.f32 %v760_v25, 0.0 }
 0x603   :  { %784 = vmatmul.f32.vlgmr.msrb.gmra.mxu2 %v763_v2 }
 0x678   :  { %v782_v30 = vpop.f32.mrf.mxu0 }
 0x679   :  { %v783_v31 = vadd.f32 %v782_v30, %v764_v29 }
 0x67b   :  { %v788_v32 = vmax.f32 %v783_v31, 0.0 }
 0x67d   :  { %807 = vmatmul.f32.vlgmr.msrb.gmra.mxu1 %v788_v32 }
 0x686   :  { %v785_v44 = vpop.f32.mrf.mxu2 }
 0x687   :  { %v786_v33 = vadd.f32 %v785_v44, %v764_v29 }
 0x689   :  { %v789_v35 = vmax.f32 %v786_v33, 0.0 }
 0x68b   :  { %810 = vmatmul.f32.vlgmr.msrb.gmra.mxu3 %v789_v35 }
 0x6fa   :  { %v808_v37 = vpop.f32.mrf.mxu1 }
 0x6fb   :  { %v809_v38 = vadd.f32 %v808_v37, %v790_v36 }
 0x6fd   :  { %v817_v39 = vmax.f32 %v809_v38, -20.0 }
 0x6ff   :  { %v819_v40 = vmin.f32 %v817_v39, 2.0 }
 0x701   :  { %v821_v42 = vmul.f32 1.442695, %v819_v40 }
 0x703   :  { %889 = vpow2.f32 %v821_v42 }
 0x709   :  { %v890_v46 = vpop.eup %889 }
 0x70a   :  { %v825_v49 = vsel %vm816_vm11, %v890_v46, %v809_v38 }
 0x70b   :  { %v827_v50 = vadd.f32 %v825_v49, %v505_v47 }
 0x70d   :  { %829 = vst [vmem:[%s1056_s2] sm:$0xff] %v827_v50 }
 0x70e   :  { %v811_v52 = vpop.f32.mrf.mxu3 }
 0x70f   :  { %v812_v53 = vadd.f32 %v811_v52, %v790_v36 }
 0x711   :  { %v818_v54 = vmax.f32 %v812_v53, -20.0 }
 0x713   :  { %v820_v55 = vmin.f32 %v818_v54, 2.0 }
 0x715   :  { %v823_v56 = vmul.f32 1.442695, %v820_v55 }
 0x717   :  { %891 = vpow2.f32 %v823_v56 }
 0x71d   :  { %v892_v57 = vpop.eup %891 }
 0x71e   :  { %v826_v59 = vsel %vm816_vm11, %v892_v57, %v812_v53 }
 0x71f   :  { %v828_v60 = vadd.f32 %v826_v59, %v508_v34 }
 0x721   :  { %830 = vst [vmem:[%s1056_s2 + $0x8] sm:$0xff] %v828_v60 }
 0x722   :  { %835 = vsyncpa [#allocation3], 1 }

</bundles_post_ra>
